<compile_context>
chip_gen: v5e
topology: v5e:2x2
jax: 0.10.0
libtpu: 0.0.40
codegen_flags: <defaults>
</compile_context>

<pallas_src>
import jax
import jax.numpy as jnp
from jax.experimental import pallas as pl
from jax.experimental.pallas import tpu as pltpu


def _round_up(x, m):
    return ((x + m - 1) // m) * m


# ----------------------------------------------------------------------------
# Tiled matmul + bias (used for hoisted gate matmuls and the vocab projection)
# ----------------------------------------------------------------------------
def _matmul_bias_kernel(a_ref, b_ref, bias_ref, o_ref, acc_ref):
    k = pl.program_id(2)

    @pl.when(k == 0)
    def _():
        acc_ref[...] = jnp.zeros_like(acc_ref)

    acc_ref[...] += jnp.dot(a_ref[...], b_ref[...],
                            preferred_element_type=jnp.float32)

    @pl.when(k == pl.num_programs(2) - 1)
    def _():
        o_ref[...] = (acc_ref[...] + bias_ref[...]).astype(o_ref.dtype)


def matmul_bias(a, b, bias, *, tm=128, tk=128, tn=256):
    """out = a @ b + bias, tiled for the MXU with an f32 VMEM accumulator."""
    M, K = a.shape
    K2, N = b.shape
    assert K == K2 and bias.shape == (N,)
    Mp, Kp, Np = _round_up(M, tm), _round_up(K, tk), _round_up(N, tn)
    a_p = jnp.pad(a.astype(jnp.float32), ((0, Mp - M), (0, Kp - K)))
    b_p = jnp.pad(b.astype(jnp.float32), ((0, Kp - K), (0, Np - N)))
    bias_p = jnp.pad(bias.astype(jnp.float32), (0, Np - N)).reshape(1, Np)

    out = pl.pallas_call(
        _matmul_bias_kernel,
        out_shape=jax.ShapeDtypeStruct((Mp, Np), jnp.float32),
        grid_spec=pltpu.PrefetchScalarGridSpec(
            num_scalar_prefetch=0,
            grid=(Mp // tm, Np // tn, Kp // tk),
            in_specs=[
                pl.BlockSpec((tm, tk), lambda i, j, k: (i, k)),
                pl.BlockSpec((tk, tn), lambda i, j, k: (k, j)),
                pl.BlockSpec((1, tn), lambda i, j, k: (0, j)),
            ],
            out_specs=pl.BlockSpec((tm, tn), lambda i, j, k: (i, j)),
            scratch_shapes=[pltpu.VMEM((tm, tn), jnp.float32)],
        ),
        compiler_params=pltpu.CompilerParams(
            dimension_semantics=("parallel", "parallel", "arbitrary")),
    )(a_p, b_p, bias_p)
    return out[:M, :N]


# ----------------------------------------------------------------------------
# LSTM recurrence: one pallas_call over grid=(T,), h/c in VMEM scratch,
# W_hh / h0 / c0 resident, fused 4-gate dot per step.
# ----------------------------------------------------------------------------
def _lstm_scan_kernel(xg_ref, whh_ref, h0_ref, c0_ref,
                      hseq_ref, hfin_ref, cfin_ref, h_sc, c_sc):
    t = pl.program_id(0)

    @pl.when(t == 0)
    def _():
        h_sc[...] = h0_ref[...]
        c_sc[...] = c0_ref[...]

    H = h_sc.shape[-1]
    # Hoisted x-side gates (already includes both biases) + h_{t-1} @ W_hh[H,4H]
    gates = xg_ref[0] + jnp.dot(h_sc[...], whh_ref[...],
                                preferred_element_type=jnp.float32)
    # PyTorch LSTM gate order: i, f, g, o
    i = jax.nn.sigmoid(gates[:, 0 * H:1 * H])
    f = jax.nn.sigmoid(gates[:, 1 * H:2 * H])
    g = jnp.tanh(gates[:, 2 * H:3 * H])
    o = jax.nn.sigmoid(gates[:, 3 * H:4 * H])
    c_new = f * c_sc[...] + i * g
    h_new = o * jnp.tanh(c_new)
    h_sc[...] = h_new
    c_sc[...] = c_new
    hseq_ref[0] = h_new
    hfin_ref[...] = h_new
    cfin_ref[...] = c_new


def lstm_scan(x_gates, w_hh, h0, c0):
    """Full LSTM recurrence in a single pallas_call (grid over time)."""
    T, B, H4 = x_gates.shape
    H = H4 // 4
    h_seq, h_fin, c_fin = pl.pallas_call(
        _lstm_scan_kernel,
        out_shape=(
            jax.ShapeDtypeStruct((T, B, H), jnp.float32),
            jax.ShapeDtypeStruct((B, H), jnp.float32),
            jax.ShapeDtypeStruct((B, H), jnp.float32),
        ),
        grid_spec=pltpu.PrefetchScalarGridSpec(
            num_scalar_prefetch=0,
            grid=(T,),
            in_specs=[
                pl.BlockSpec((1, B, H4), lambda t: (t, 0, 0)),  # per-step gates
                pl.BlockSpec((H, H4), lambda t: (0, 0)),        # W_hh resident
                pl.BlockSpec((B, H), lambda t: (0, 0)),         # h0 resident
                pl.BlockSpec((B, H), lambda t: (0, 0)),         # c0 resident
            ],
            out_specs=(
                pl.BlockSpec((1, B, H), lambda t: (t, 0, 0)),   # h_t per step
                pl.BlockSpec((B, H), lambda t: (0, 0)),         # final h
                pl.BlockSpec((B, H), lambda t: (0, 0)),         # final c
            ),
            scratch_shapes=[pltpu.VMEM((B, H), jnp.float32),
                            pltpu.VMEM((B, H), jnp.float32)],
        ),
        compiler_params=pltpu.CompilerParams(
            dimension_semantics=("arbitrary",)),
    )(x_gates, w_hh, h0, c0)
    return h_seq, h_fin, c_fin


# ----------------------------------------------------------------------------
# ChatbotModel.forward (non-attention branch, tf_ratio = 1.0)
# ----------------------------------------------------------------------------
def chatbot_forward(params, X, y):
    """X: [seq_x, batch] int32 ids, y: [seq_y, batch] int32 ids.
    Returns [seq_y, batch, vocab] f32 with outputs[0] == 0."""
    Tx, B = X.shape
    Ty, _ = y.shape
    H = params["enc_w_hh"].shape[0]
    V = params["dec_w_out"].shape[1]

    # ------------------------------ encoder ------------------------------
    # Embedding lookup is XLA glue feeding the hoisted gate matmul.
    # TODO(synk): for very large vocabularies move the gather in-kernel via
    # PrefetchScalarGridSpec + pl.Element row-gather on the embedding table.
    enc_emb = jnp.take(params["enc_emb"], X.reshape(-1), axis=0)        # [Tx*B, E]
    enc_xg = matmul_bias(enc_emb, params["enc_w_ih"],
                         params["enc_b_ih"] + params["enc_b_hh"],
                         tn=256).reshape(Tx, B, 4 * H)
    h0 = jnp.zeros((B, H), jnp.float32)
    c0 = jnp.zeros((B, H), jnp.float32)
    _, h_n, c_n = lstm_scan(enc_xg, params["enc_w_hh"], h0, c0)

    # ------------------- decoder (teacher forcing, tf=1.0) -------------------
    # tf_ratio = 1.0 -> np.random.multinomial([1, 0]) always picks y[t]; the
    # decoder input sequence is y[0 : Ty-1] and is known ahead of time.
    # TODO(synk): tf_ratio < 1.0 needs per-step argmax feedback, which forbids
    # hoisting the embedding/projection matmuls out of the recurrence.
    dec_in = y[:Ty - 1].reshape(-1)                                     # [(Ty-1)*B]
    dec_emb = jnp.take(params["dec_emb"], dec_in, axis=0)               # [(Ty-1)*B, E]
    dec_xg = matmul_bias(dec_emb, params["dec_w_ih"],
                         params["dec_b_ih"] + params["dec_b_hh"],
                         tn=256).reshape(Ty - 1, B, 4 * H)
    h_seq, _, _ = lstm_scan(dec_xg, params["dec_w_hh"], h_n, c_n)       # [Ty-1, B, H]

    # --------------- batched, lane-dense vocab projection ---------------
    logits = matmul_bias(h_seq.reshape((Ty - 1) * B, H),
                         params["dec_w_out"], params["dec_b_out"],
                         tn=256).reshape(Ty - 1, B, V)
    outputs = jnp.concatenate(
        [jnp.zeros((1, B, V), jnp.float32), logits], axis=0)
    return outputs

    # TODO(synk): attention branch (with_attention=True) not implemented; the
    # reference forward needs a concrete attention-decoder module to specify it.


# ----------------------------------------------------------------------------
# Pure-JAX reference (same math, per-step loop) for validation
# ----------------------------------------------------------------------------
def _lstm_cell_ref(x_emb, h, c, w_ih, w_hh, b_ih, b_hh):
    gates = x_emb @ w_ih + h @ w_hh + b_ih + b_hh
    i, f, g, o = jnp.split(gates, 4, axis=-1)
    i = jax.nn.sigmoid(i)
    f = jax.nn.sigmoid(f)
    g = jnp.tanh(g)
    o = jax.nn.sigmoid(o)
    c_new = f * c + i * g
    h_new = o * jnp.tanh(c_new)
    return h_new, c_new


def reference_forward(params, X, y):
    Tx, B = X.shape
    Ty, _ = y.shape
    H = params["enc_w_hh"].shape[0]
    V = params["dec_w_out"].shape[1]
    h = jnp.zeros((B, H), jnp.float32)
    c = jnp.zeros((B, H), jnp.float32)
    for t in range(Tx):
        x_emb = params["enc_emb"][X[t]]
        h, c = _lstm_cell_ref(x_emb, h, c, params["enc_w_ih"],
                              params["enc_w_hh"], params["enc_b_ih"],
                              params["enc_b_hh"])
    outs = [jnp.zeros((B, V), jnp.float32)]
    word = y[0]
    for t in range(1, Ty):
        x_emb = params["dec_emb"][word]
        h, c = _lstm_cell_ref(x_emb, h, c, params["dec_w_ih"],
                              params["dec_w_hh"], params["dec_b_ih"],
                              params["dec_b_hh"])
        outs.append(h @ params["dec_w_out"] + params["dec_b_out"])
        word = y[t]  # tf_ratio = 1.0 -> always teacher-force
    return jnp.stack(outs, axis=0)


if __name__ == "__main__":
    V, E, H, B, Tx, Ty = 256, 128, 128, 8, 8, 8
    key = jax.random.PRNGKey(0)
    ks = jax.random.split(key, 14)

    def u(k, shape, scale=0.1):
        return jax.random.uniform(k, shape, jnp.float32, -scale, scale)

    params = {
        "enc_emb":  u(ks[0], (V, E)),
        "enc_w_ih": u(ks[1], (E, 4 * H)),
        "enc_w_hh": u(ks[2], (H, 4 * H)),
        "enc_b_ih": u(ks[3], (4 * H,)),
        "enc_b_hh": u(ks[4], (4 * H,)),
        "dec_emb":  u(ks[5], (V, E)),
        "dec_w_ih": u(ks[6], (E, 4 * H)),
        "dec_w_hh": u(ks[7], (H, 4 * H)),
        "dec_b_ih": u(ks[8], (4 * H,)),
        "dec_b_hh": u(ks[9], (4 * H,)),
        "dec_w_out": u(ks[10], (H, V)),
        "dec_b_out": u(ks[11], (V,)),
    }
    X = jax.random.randint(ks[12], (Tx, B), 0, V, dtype=jnp.int32)
    y = jax.random.randint(ks[13], (Ty, B), 0, V, dtype=jnp.int32)

    out = jax.jit(chatbot_forward)(params, X, y)
    out = jax.block_until_ready(out)

    ref = reference_forward(params, X, y)
    max_err = float(jnp.max(jnp.abs(out - ref)))
    assert out.shape == (Ty, B, V)
    assert max_err < 5e-2, f"mismatch vs reference: max |err| = {max_err}"
    print("KERNEL_OK")
</pallas_src>

<mosaic_0001>
module attributes {stable_mosaic.version = 11 : i64} {
  func.func @_matmul_bias_kernel(%arg0: i32, %arg1: i32, %arg2: i32, %arg3: memref<128x128xf32, #tpu.memory_space<vmem>>, %arg4: memref<128x256xf32, #tpu.memory_space<vmem>>, %arg5: memref<1x256xf32, #tpu.memory_space<vmem>>, %arg6: memref<128x256xf32, #tpu.memory_space<vmem>>, %arg7: memref<128x256xf32, #tpu.memory_space<vmem>>) attributes {dimension_semantics = [#tpu.dimension_semantics<parallel>, #tpu.dimension_semantics<parallel>, #tpu.dimension_semantics<arbitrary>], iteration_bounds = array<i64: 1, 2, 1>, scalar_prefetch = 0 : i64, scratch_operands = 1 : i64, tpu.core_type = #tpu.core_type<tc>, window_params = [{transform_indices = @transform_0, window_bounds = array<i64: 128, 128>}, {transform_indices = @transform_1, window_bounds = array<i64: 128, 256>}, {transform_indices = @transform_2, window_bounds = array<i64: 1, 256>}, {transform_indices = @transform_3, window_bounds = array<i64: 128, 256>}]} {
    %c0_i32 = arith.constant 0 : i32
    %0 = arith.cmpi eq, %arg2, %c0_i32 : i32
    %1 = arith.extui %0 : i1 to i32
    %c0_i32_0 = arith.constant 0 : i32
    %2 = arith.cmpi ne, %1, %c0_i32_0 : i32
    scf.if %2 {
      %cst_10 = arith.constant 0.000000e+00 : f32
      %12 = vector.broadcast %cst_10 : f32 to vector<128x256xf32>
      %c0_11 = arith.constant 0 : index
      %c0_12 = arith.constant 0 : index
      %13 = vector.load %arg7[%c0_11, %c0_12] : memref<128x256xf32, #tpu.memory_space<vmem>>, vector<128x256xf32>
      tpu.vector_store %arg7[%c0_11, %c0_12], %12 {strides = array<i32>} : memref<128x256xf32, #tpu.memory_space<vmem>>, vector<128x256xf32>,
    } else {
    }
    %c0 = arith.constant 0 : index
    %c0_1 = arith.constant 0 : index
    %3 = vector.load %arg7[%c0, %c0_1] : memref<128x256xf32, #tpu.memory_space<vmem>>, vector<128x256xf32>
    %c0_2 = arith.constant 0 : index
    %c0_3 = arith.constant 0 : index
    %4 = vector.load %arg3[%c0_2, %c0_3] : memref<128x128xf32, #tpu.memory_space<vmem>>, vector<128x128xf32>
    %c0_4 = arith.constant 0 : index
    %c0_5 = arith.constant 0 : index
    %5 = vector.load %arg4[%c0_4, %c0_5] : memref<128x256xf32, #tpu.memory_space<vmem>>, vector<128x256xf32>
    %cst = arith.constant dense<0.000000e+00> : vector<128x256xf32>
    %6 = tpu.matmul %4, %5, %cst {dimension_numbers = #tpu.dot_dimension_numbers<[1], [0], [0], [1], [0, 0, 1, 1], [], []>} : vector<128x128xf32>, vector<128x256xf32>, vector<128x256xf32> -> vector<128x256xf32>
    %7 = arith.addf %3, %6 : vector<128x256xf32>
    %c0_6 = arith.constant 0 : index
    %c0_7 = arith.constant 0 : index
    %8 = vector.load %arg7[%c0_6, %c0_7] : memref<128x256xf32, #tpu.memory_space<vmem>>, vector<128x256xf32>
    tpu.vector_store %arg7[%c0_6, %c0_7], %7 {strides = array<i32>} : memref<128x256xf32, #tpu.memory_space<vmem>>, vector<128x256xf32>,
    %c0_i32_8 = arith.constant 0 : i32
    %9 = arith.cmpi eq, %arg2, %c0_i32_8 : i32
    %10 = arith.extui %9 : i1 to i32
    %c0_i32_9 = arith.constant 0 : i32
    %11 = arith.cmpi ne, %10, %c0_i32_9 : i32
    scf.if %11 {
      %c0_10 = arith.constant 0 : index
      %c0_11 = arith.constant 0 : index
      %12 = vector.load %arg7[%c0_10, %c0_11] : memref<128x256xf32, #tpu.memory_space<vmem>>, vector<128x256xf32>
      %c0_12 = arith.constant 0 : index
      %c0_13 = arith.constant 0 : index
      %13 = vector.load %arg5[%c0_12, %c0_13] : memref<1x256xf32, #tpu.memory_space<vmem>>, vector<1x256xf32>
      %14 = vector.broadcast %13 : vector<1x256xf32> to vector<128x256xf32>
      %15 = arith.addf %12, %14 : vector<128x256xf32>
      %c0_14 = arith.constant 0 : index
      %c0_15 = arith.constant 0 : index
      %16 = vector.load %arg6[%c0_14, %c0_15] : memref<128x256xf32, #tpu.memory_space<vmem>>, vector<128x256xf32>
      tpu.vector_store %arg6[%c0_14, %c0_15], %15 {strides = array<i32>} : memref<128x256xf32, #tpu.memory_space<vmem>>, vector<128x256xf32>,
    } else {
    }
    return
  }
  func.func @transform_0(%arg0: i32, %arg1: i32, %arg2: i32) -> (i32, i32) {
    %c0_i32 = arith.constant 0 : i32
    return %arg0, %arg2 : i32, i32
  }
  func.func @transform_1(%arg0: i32, %arg1: i32, %arg2: i32) -> (i32, i32) {
    %c0_i32 = arith.constant 0 : i32
    return %arg2, %arg1 : i32, i32
  }
  func.func @transform_2(%arg0: i32, %arg1: i32, %arg2: i32) -> (i32, i32) {
    %c0_i32 = arith.constant 0 : i32
    %c0_i32_0 = arith.constant 0 : i32
    return %c0_i32, %arg1 : i32, i32
  }
  func.func @transform_3(%arg0: i32, %arg1: i32, %arg2: i32) -> (i32, i32) {
    %c0_i32 = arith.constant 0 : i32
    return %arg0, %arg1 : i32, i32
  }
}

module attributes {stable_mosaic.version = 11 : i64} {
  func.func @_lstm_scan_kernel(%arg0: i32, %arg1: memref<1x8x512xf32, #tpu.memory_space<vmem>>, %arg2: memref<128x512xf32, #tpu.memory_space<vmem>>, %arg3: memref<8x128xf32, #tpu.memory_space<vmem>>, %arg4: memref<8x128xf32, #tpu.memory_space<vmem>>, %arg5: memref<1x8x128xf32, #tpu.memory_space<vmem>>, %arg6: memref<8x128xf32, #tpu.memory_space<vmem>>, %arg7: memref<8x128xf32, #tpu.memory_space<vmem>>, %arg8: memref<8x128xf32, #tpu.memory_space<vmem>>, %arg9: memref<8x128xf32, #tpu.memory_space<vmem>>) attributes {dimension_semantics = [#tpu.dimension_semantics<arbitrary>], iteration_bounds = array<i64: 7>, scalar_prefetch = 0 : i64, scratch_operands = 2 : i64, tpu.core_type = #tpu.core_type<tc>, window_params = [{transform_indices = @transform_0, window_bounds = array<i64: 1, 8, 512>}, {pipeline_mode = #tpu.pipeline_mode<synchronous>, transform_indices = @transform_1, window_bounds = array<i64: 128, 512>}, {pipeline_mode = #tpu.pipeline_mode<synchronous>, transform_indices = @transform_2, window_bounds = array<i64: 8, 128>}, {pipeline_mode = #tpu.pipeline_mode<synchronous>, transform_indices = @transform_3, window_bounds = array<i64: 8, 128>}, {transform_indices = @transform_4, window_bounds = array<i64: 1, 8, 128>}, {pipeline_mode = #tpu.pipeline_mode<synchronous>, transform_indices = @transform_5, window_bounds = array<i64: 8, 128>}, {pipeline_mode = #tpu.pipeline_mode<synchronous>, transform_indices = @transform_6, window_bounds = array<i64: 8, 128>}]} {
    %c0_i32 = arith.constant 0 : i32
    %0 = arith.cmpi eq, %arg0, %c0_i32 : i32
    %1 = arith.extui %0 : i1 to i32
    %c0_i32_0 = arith.constant 0 : i32
    %2 = arith.cmpi ne, %1, %c0_i32_0 : i32
    scf.if %2 {
      %c0_23 = arith.constant 0 : index
      %c0_24 = arith.constant 0 : index
      %42 = vector.load %arg3[%c0_23, %c0_24] : memref<8x128xf32, #tpu.memory_space<vmem>>, vector<8x128xf32>
      %c0_25 = arith.constant 0 : index
      %c0_26 = arith.constant 0 : index
      %43 = vector.load %arg8[%c0_25, %c0_26] : memref<8x128xf32, #tpu.memory_space<vmem>>, vector<8x128xf32>
      tpu.vector_store %arg8[%c0_25, %c0_26], %42 {strides = array<i32>} : memref<8x128xf32, #tpu.memory_space<vmem>>, vector<8x128xf32>,
      %c0_27 = arith.constant 0 : index
      %c0_28 = arith.constant 0 : index
      %44 = vector.load %arg4[%c0_27, %c0_28] : memref<8x128xf32, #tpu.memory_space<vmem>>, vector<8x128xf32>
      %c0_29 = arith.constant 0 : index
      %c0_30 = arith.constant 0 : index
      %45 = vector.load %arg9[%c0_29, %c0_30] : memref<8x128xf32, #tpu.memory_space<vmem>>, vector<8x128xf32>
      tpu.vector_store %arg9[%c0_29, %c0_30], %44 {strides = array<i32>} : memref<8x128xf32, #tpu.memory_space<vmem>>, vector<8x128xf32>,
    } else {
    }
    %c0 = arith.constant 0 : index
    %c0_1 = arith.constant 0 : index
    %c0_2 = arith.constant 0 : index
    %3 = vector.load %arg1[%c0, %c0_1, %c0_2] : memref<1x8x512xf32, #tpu.memory_space<vmem>>, vector<1x8x512xf32>
    %4 = vector.shape_cast %3 : vector<1x8x512xf32> to vector<8x512xf32>
    %c0_3 = arith.constant 0 : index
    %c0_4 = arith.constant 0 : index
    %5 = vector.load %arg8[%c0_3, %c0_4] : memref<8x128xf32, #tpu.memory_space<vmem>>, vector<8x128xf32>
    %c0_5 = arith.constant 0 : index
    %c0_6 = arith.constant 0 : index
    %6 = vector.load %arg2[%c0_5, %c0_6] : memref<128x512xf32, #tpu.memory_space<vmem>>, vector<128x512xf32>
    %cst = arith.constant dense<0.000000e+00> : vector<8x512xf32>
    %7 = tpu.matmul %5, %6, %cst {dimension_numbers = #tpu.dot_dimension_numbers<[1], [0], [0], [1], [0, 0, 1, 1], [], []>} : vector<8x128xf32>, vector<128x512xf32>, vector<8x512xf32> -> vector<8x512xf32>
    %8 = arith.addf %4, %7 : vector<8x512xf32>
    %9 = vector.extract_strided_slice %8 {offsets = [0, 0], sizes = [8, 128], strides = [1, 1]} : vector<8x512xf32> to vector<8x128xf32>
    %10 = arith.negf %9 : vector<8x128xf32>
    %11 = math.exp %10 : vector<8x128xf32>
    %cst_7 = arith.constant 1.000000e+00 : f32
    %12 = vector.broadcast %cst_7 : f32 to vector<8x128xf32>
    %13 = arith.addf %12, %11 : vector<8x128xf32>
    %14 = arith.divf %12, %13 : vector<8x128xf32>
    %15 = vector.extract_strided_slice %8 {offsets = [0, 128], sizes = [8, 128], strides = [1, 1]} : vector<8x512xf32> to vector<8x128xf32>
    %16 = arith.negf %15 : vector<8x128xf32>
    %17 = math.exp %16 : vector<8x128xf32>
    %cst_8 = arith.constant 1.000000e+00 : f32
    %18 = vector.broadcast %cst_8 : f32 to vector<8x128xf32>
    %19 = arith.addf %18, %17 : vector<8x128xf32>
    %20 = arith.divf %18, %19 : vector<8x128xf32>
    %21 = vector.extract_strided_slice %8 {offsets = [0, 256], sizes = [8, 128], strides = [1, 1]} : vector<8x512xf32> to vector<8x128xf32>
    %22 = math.tanh %21 : vector<8x128xf32>
    %23 = vector.extract_strided_slice %8 {offsets = [0, 384], sizes = [8, 128], strides = [1, 1]} : vector<8x512xf32> to vector<8x128xf32>
    %24 = arith.negf %23 : vector<8x128xf32>
    %25 = math.exp %24 : vector<8x128xf32>
    %cst_9 = arith.constant 1.000000e+00 : f32
    %26 = vector.broadcast %cst_9 : f32 to vector<8x128xf32>
    %27 = arith.addf %26, %25 : vector<8x128xf32>
    %28 = arith.divf %26, %27 : vector<8x128xf32>
    %c0_10 = arith.constant 0 : index
    %c0_11 = arith.constant 0 : index
    %29 = vector.load %arg9[%c0_10, %c0_11] : memref<8x128xf32, #tpu.memory_space<vmem>>, vector<8x128xf32>
    %30 = arith.mulf %20, %29 : vector<8x128xf32>
    %31 = arith.mulf %14, %22 : vector<8x128xf32>
    %32 = arith.addf %30, %31 : vector<8x128xf32>
    %33 = math.tanh %32 : vector<8x128xf32>
    %34 = arith.mulf %28, %33 : vector<8x128xf32>
    %c0_12 = arith.constant 0 : index
    %c0_13 = arith.constant 0 : index
    %35 = vector.load %arg8[%c0_12, %c0_13] : memref<8x128xf32, #tpu.memory_space<vmem>>, vector<8x128xf32>
    tpu.vector_store %arg8[%c0_12, %c0_13], %34 {strides = array<i32>} : memref<8x128xf32, #tpu.memory_space<vmem>>, vector<8x128xf32>,
    %c0_14 = arith.constant 0 : index
    %c0_15 = arith.constant 0 : index
    %36 = vector.load %arg9[%c0_14, %c0_15] : memref<8x128xf32, #tpu.memory_space<vmem>>, vector<8x128xf32>
    tpu.vector_store %arg9[%c0_14, %c0_15], %32 {strides = array<i32>} : memref<8x128xf32, #tpu.memory_space<vmem>>, vector<8x128xf32>,
    %c0_16 = arith.constant 0 : index
    %c0_17 = arith.constant 0 : index
    %c0_18 = arith.constant 0 : index
    %37 = vector.load %arg5[%c0_16, %c0_17, %c0_18] : memref<1x8x128xf32, #tpu.memory_space<vmem>>, vector<1x8x128xf32>
    %38 = vector.shape_cast %37 : vector<1x8x128xf32> to vector<8x128xf32>
    %39 = vector.shape_cast %34 : vector<8x128xf32> to vector<1x8x128xf32>
    tpu.vector_store %arg5[%c0_16, %c0_17, %c0_18], %39 {strides = array<i32>} : memref<1x8x128xf32, #tpu.memory_space<vmem>>, vector<1x8x128xf32>,
    %c0_19 = arith.constant 0 : index
    %c0_20 = arith.constant 0 : index
    %40 = vector.load %arg6[%c0_19, %c0_20] : memref<8x128xf32, #tpu.memory_space<vmem>>, vector<8x128xf32>
    tpu.vector_store %arg6[%c0_19, %c0_20], %34 {strides = array<i32>} : memref<8x128xf32, #tpu.memory_space<vmem>>, vector<8x128xf32>,
    %c0_21 = arith.constant 0 : index
    %c0_22 = arith.constant 0 : index
    %41 = vector.load %arg7[%c0_21, %c0_22] : memref<8x128xf32, #tpu.memory_space<vmem>>, vector<8x128xf32>
    tpu.vector_store %arg7[%c0_21, %c0_22], %32 {strides = array<i32>} : memref<8x128xf32, #tpu.memory_space<vmem>>, vector<8x128xf32>,
    return
  }
  func.func @transform_0(%arg0: i32) -> (i32, i32, i32) {
    %c0_i32 = arith.constant 0 : i32
    %c0_i32_0 = arith.constant 0 : i32
    %c0_i32_1 = arith.constant 0 : i32
    return %arg0, %c0_i32, %c0_i32_0 : i32, i32, i32
  }
  func.func @transform_1(%arg0: i32) -> (i32, i32) {
    %c0_i32 = arith.constant 0 : i32
    %c0_i32_0 = arith.constant 0 : i32
    %c0_i32_1 = arith.constant 0 : i32
    return %c0_i32, %c0_i32_0 : i32, i32
  }
  func.func @transform_2(%arg0: i32) -> (i32, i32) {
    %c0_i32 = arith.constant 0 : i32
    %c0_i32_0 = arith.constant 0 : i32
    %c0_i32_1 = arith.constant 0 : i32
    return %c0_i32, %c0_i32_0 : i32, i32
  }
  func.func @transform_3(%arg0: i32) -> (i32, i32) {
    %c0_i32 = arith.constant 0 : i32
    %c0_i32_0 = arith.constant 0 : i32
    %c0_i32_1 = arith.constant 0 : i32
    return %c0_i32, %c0_i32_0 : i32, i32
  }
  func.func @transform_4(%arg0: i32) -> (i32, i32, i32) {
    %c0_i32 = arith.constant 0 : i32
    %c0_i32_0 = arith.constant 0 : i32
    %c0_i32_1 = arith.constant 0 : i32
    return %arg0, %c0_i32, %c0_i32_0 : i32, i32, i32
  }
  func.func @transform_5(%arg0: i32) -> (i32, i32) {
    %c0_i32 = arith.constant 0 : i32
    %c0_i32_0 = arith.constant 0 : i32
    %c0_i32_1 = arith.constant 0 : i32
    return %c0_i32, %c0_i32_0 : i32, i32
  }
  func.func @transform_6(%arg0: i32) -> (i32, i32) {
    %c0_i32 = arith.constant 0 : i32
    %c0_i32_0 = arith.constant 0 : i32
    %c0_i32_1 = arith.constant 0 : i32
    return %c0_i32, %c0_i32_0 : i32, i32
  }
}

module attributes {stable_mosaic.version = 11 : i64} {
  func.func @_matmul_bias_kernel(%arg0: i32, %arg1: i32, %arg2: i32, %arg3: memref<128x128xf32, #tpu.memory_space<vmem>>, %arg4: memref<128x256xf32, #tpu.memory_space<vmem>>, %arg5: memref<1x256xf32, #tpu.memory_space<vmem>>, %arg6: memref<128x256xf32, #tpu.memory_space<vmem>>, %arg7: memref<128x256xf32, #tpu.memory_space<vmem>>) attributes {dimension_semantics = [#tpu.dimension_semantics<parallel>, #tpu.dimension_semantics<parallel>, #tpu.dimension_semantics<arbitrary>], iteration_bounds = array<i64: 1, 1, 1>, scalar_prefetch = 0 : i64, scratch_operands = 1 : i64, tpu.core_type = #tpu.core_type<tc>, window_params = [{transform_indices = @transform_0, window_bounds = array<i64: 128, 128>}, {transform_indices = @transform_1, window_bounds = array<i64: 128, 256>}, {transform_indices = @transform_2, window_bounds = array<i64: 1, 256>}, {transform_indices = @transform_3, window_bounds = array<i64: 128, 256>}]} {
    %c0_i32 = arith.constant 0 : i32
    %0 = arith.cmpi eq, %arg2, %c0_i32 : i32
    %1 = arith.extui %0 : i1 to i32
    %c0_i32_0 = arith.constant 0 : i32
    %2 = arith.cmpi ne, %1, %c0_i32_0 : i32
    scf.if %2 {
      %cst_10 = arith.constant 0.000000e+00 : f32
      %12 = vector.broadcast %cst_10 : f32 to vector<128x256xf32>
      %c0_11 = arith.constant 0 : index
      %c0_12 = arith.constant 0 : index
      %13 = vector.load %arg7[%c0_11, %c0_12] : memref<128x256xf32, #tpu.memory_space<vmem>>, vector<128x256xf32>
      tpu.vector_store %arg7[%c0_11, %c0_12], %12 {strides = array<i32>} : memref<128x256xf32, #tpu.memory_space<vmem>>, vector<128x256xf32>,
    } else {
    }
    %c0 = arith.constant 0 : index
    %c0_1 = arith.constant 0 : index
    %3 = vector.load %arg7[%c0, %c0_1] : memref<128x256xf32, #tpu.memory_space<vmem>>, vector<128x256xf32>
    %c0_2 = arith.constant 0 : index
    %c0_3 = arith.constant 0 : index
    %4 = vector.load %arg3[%c0_2, %c0_3] : memref<128x128xf32, #tpu.memory_space<vmem>>, vector<128x128xf32>
    %c0_4 = arith.constant 0 : index
    %c0_5 = arith.constant 0 : index
    %5 = vector.load %arg4[%c0_4, %c0_5] : memref<128x256xf32, #tpu.memory_space<vmem>>, vector<128x256xf32>
    %cst = arith.constant dense<0.000000e+00> : vector<128x256xf32>
    %6 = tpu.matmul %4, %5, %cst {dimension_numbers = #tpu.dot_dimension_numbers<[1], [0], [0], [1], [0, 0, 1, 1], [], []>} : vector<128x128xf32>, vector<128x256xf32>, vector<128x256xf32> -> vector<128x256xf32>
    %7 = arith.addf %3, %6 : vector<128x256xf32>
    %c0_6 = arith.constant 0 : index
    %c0_7 = arith.constant 0 : index
    %8 = vector.load %arg7[%c0_6, %c0_7] : memref<128x256xf32, #tpu.memory_space<vmem>>, vector<128x256xf32>
    tpu.vector_store %arg7[%c0_6, %c0_7], %7 {strides = array<i32>} : memref<128x256xf32, #tpu.memory_space<vmem>>, vector<128x256xf32>,
    %c0_i32_8 = arith.constant 0 : i32
    %9 = arith.cmpi eq, %arg2, %c0_i32_8 : i32
    %10 = arith.extui %9 : i1 to i32
    %c0_i32_9 = arith.constant 0 : i32
    %11 = arith.cmpi ne, %10, %c0_i32_9 : i32
    scf.if %11 {
      %c0_10 = arith.constant 0 : index
      %c0_11 = arith.constant 0 : index
      %12 = vector.load %arg7[%c0_10, %c0_11] : memref<128x256xf32, #tpu.memory_space<vmem>>, vector<128x256xf32>
      %c0_12 = arith.constant 0 : index
      %c0_13 = arith.constant 0 : index
      %13 = vector.load %arg5[%c0_12, %c0_13] : memref<1x256xf32, #tpu.memory_space<vmem>>, vector<1x256xf32>
      %14 = vector.broadcast %13 : vector<1x256xf32> to vector<128x256xf32>
      %15 = arith.addf %12, %14 : vector<128x256xf32>
      %c0_14 = arith.constant 0 : index
      %c0_15 = arith.constant 0 : index
      %16 = vector.load %arg6[%c0_14, %c0_15] : memref<128x256xf32, #tpu.memory_space<vmem>>, vector<128x256xf32>
      tpu.vector_store %arg6[%c0_14, %c0_15], %15 {strides = array<i32>} : memref<128x256xf32, #tpu.memory_space<vmem>>, vector<128x256xf32>,
    } else {
    }
    return
  }
  func.func @transform_0(%arg0: i32, %arg1: i32, %arg2: i32) -> (i32, i32) {
    %c0_i32 = arith.constant 0 : i32
    return %arg0, %arg2 : i32, i32
  }
  func.func @transform_1(%arg0: i32, %arg1: i32, %arg2: i32) -> (i32, i32) {
    %c0_i32 = arith.constant 0 : i32
    return %arg2, %arg1 : i32, i32
  }
  func.func @transform_2(%arg0: i32, %arg1: i32, %arg2: i32) -> (i32, i32) {
    %c0_i32 = arith.constant 0 : i32
    %c0_i32_0 = arith.constant 0 : i32
    return %c0_i32, %arg1 : i32, i32
  }
  func.func @transform_3(%arg0: i32, %arg1: i32, %arg2: i32) -> (i32, i32) {
    %c0_i32 = arith.constant 0 : i32
    return %arg0, %arg1 : i32, i32
  }
}

module attributes {stable_mosaic.version = 11 : i64} {
  func.func @_lstm_scan_kernel(%arg0: i32, %arg1: memref<1x8x512xf32, #tpu.memory_space<vmem>>, %arg2: memref<128x512xf32, #tpu.memory_space<vmem>>, %arg3: memref<8x128xf32, #tpu.memory_space<vmem>>, %arg4: memref<8x128xf32, #tpu.memory_space<vmem>>, %arg5: memref<1x8x128xf32, #tpu.memory_space<vmem>>, %arg6: memref<8x128xf32, #tpu.memory_space<vmem>>, %arg7: memref<8x128xf32, #tpu.memory_space<vmem>>, %arg8: memref<8x128xf32, #tpu.memory_space<vmem>>, %arg9: memref<8x128xf32, #tpu.memory_space<vmem>>) attributes {dimension_semantics = [#tpu.dimension_semantics<arbitrary>], iteration_bounds = array<i64: 8>, scalar_prefetch = 0 : i64, scratch_operands = 2 : i64, tpu.core_type = #tpu.core_type<tc>, window_params = [{transform_indices = @transform_0, window_bounds = array<i64: 1, 8, 512>}, {pipeline_mode = #tpu.pipeline_mode<synchronous>, transform_indices = @transform_1, window_bounds = array<i64: 128, 512>}, {pipeline_mode = #tpu.pipeline_mode<synchronous>, transform_indices = @transform_2, window_bounds = array<i64: 8, 128>}, {pipeline_mode = #tpu.pipeline_mode<synchronous>, transform_indices = @transform_3, window_bounds = array<i64: 8, 128>}, {transform_indices = @transform_4, window_bounds = array<i64: 1, 8, 128>}, {pipeline_mode = #tpu.pipeline_mode<synchronous>, transform_indices = @transform_5, window_bounds = array<i64: 8, 128>}, {pipeline_mode = #tpu.pipeline_mode<synchronous>, transform_indices = @transform_6, window_bounds = array<i64: 8, 128>}]} {
    %c0_i32 = arith.constant 0 : i32
    %0 = arith.cmpi eq, %arg0, %c0_i32 : i32
    %1 = arith.extui %0 : i1 to i32
    %c0_i32_0 = arith.constant 0 : i32
    %2 = arith.cmpi ne, %1, %c0_i32_0 : i32
    scf.if %2 {
      %c0_23 = arith.constant 0 : index
      %c0_24 = arith.constant 0 : index
      %42 = vector.load %arg3[%c0_23, %c0_24] : memref<8x128xf32, #tpu.memory_space<vmem>>, vector<8x128xf32>
      %c0_25 = arith.constant 0 : index
      %c0_26 = arith.constant 0 : index
      %43 = vector.load %arg8[%c0_25, %c0_26] : memref<8x128xf32, #tpu.memory_space<vmem>>, vector<8x128xf32>
      tpu.vector_store %arg8[%c0_25, %c0_26], %42 {strides = array<i32>} : memref<8x128xf32, #tpu.memory_space<vmem>>, vector<8x128xf32>,
      %c0_27 = arith.constant 0 : index
      %c0_28 = arith.constant 0 : index
      %44 = vector.load %arg4[%c0_27, %c0_28] : memref<8x128xf32, #tpu.memory_space<vmem>>, vector<8x128xf32>
      %c0_29 = arith.constant 0 : index
      %c0_30 = arith.constant 0 : index
      %45 = vector.load %arg9[%c0_29, %c0_30] : memref<8x128xf32, #tpu.memory_space<vmem>>, vector<8x128xf32>
      tpu.vector_store %arg9[%c0_29, %c0_30], %44 {strides = array<i32>} : memref<8x128xf32, #tpu.memory_space<vmem>>, vector<8x128xf32>,
    } else {
    }
    %c0 = arith.constant 0 : index
    %c0_1 = arith.constant 0 : index
    %c0_2 = arith.constant 0 : index
    %3 = vector.load %arg1[%c0, %c0_1, %c0_2] : memref<1x8x512xf32, #tpu.memory_space<vmem>>, vector<1x8x512xf32>
    %4 = vector.shape_cast %3 : vector<1x8x512xf32> to vector<8x512xf32>
    %c0_3 = arith.constant 0 : index
    %c0_4 = arith.constant 0 : index
    %5 = vector.load %arg8[%c0_3, %c0_4] : memref<8x128xf32, #tpu.memory_space<vmem>>, vector<8x128xf32>
    %c0_5 = arith.constant 0 : index
    %c0_6 = arith.constant 0 : index
    %6 = vector.load %arg2[%c0_5, %c0_6] : memref<128x512xf32, #tpu.memory_space<vmem>>, vector<128x512xf32>
    %cst = arith.constant dense<0.000000e+00> : vector<8x512xf32>
    %7 = tpu.matmul %5, %6, %cst {dimension_numbers = #tpu.dot_dimension_numbers<[1], [0], [0], [1], [0, 0, 1, 1], [], []>} : vector<8x128xf32>, vector<128x512xf32>, vector<8x512xf32> -> vector<8x512xf32>
    %8 = arith.addf %4, %7 : vector<8x512xf32>
    %9 = vector.extract_strided_slice %8 {offsets = [0, 0], sizes = [8, 128], strides = [1, 1]} : vector<8x512xf32> to vector<8x128xf32>
    %10 = arith.negf %9 : vector<8x128xf32>
    %11 = math.exp %10 : vector<8x128xf32>
    %cst_7 = arith.constant 1.000000e+00 : f32
    %12 = vector.broadcast %cst_7 : f32 to vector<8x128xf32>
    %13 = arith.addf %12, %11 : vector<8x128xf32>
    %14 = arith.divf %12, %13 : vector<8x128xf32>
    %15 = vector.extract_strided_slice %8 {offsets = [0, 128], sizes = [8, 128], strides = [1, 1]} : vector<8x512xf32> to vector<8x128xf32>
    %16 = arith.negf %15 : vector<8x128xf32>
    %17 = math.exp %16 : vector<8x128xf32>
    %cst_8 = arith.constant 1.000000e+00 : f32
    %18 = vector.broadcast %cst_8 : f32 to vector<8x128xf32>
    %19 = arith.addf %18, %17 : vector<8x128xf32>
    %20 = arith.divf %18, %19 : vector<8x128xf32>
    %21 = vector.extract_strided_slice %8 {offsets = [0, 256], sizes = [8, 128], strides = [1, 1]} : vector<8x512xf32> to vector<8x128xf32>
    %22 = math.tanh %21 : vector<8x128xf32>
    %23 = vector.extract_strided_slice %8 {offsets = [0, 384], sizes = [8, 128], strides = [1, 1]} : vector<8x512xf32> to vector<8x128xf32>
    %24 = arith.negf %23 : vector<8x128xf32>
    %25 = math.exp %24 : vector<8x128xf32>
    %cst_9 = arith.constant 1.000000e+00 : f32
    %26 = vector.broadcast %cst_9 : f32 to vector<8x128xf32>
    %27 = arith.addf %26, %25 : vector<8x128xf32>
    %28 = arith.divf %26, %27 : vector<8x128xf32>
    %c0_10 = arith.constant 0 : index
    %c0_11 = arith.constant 0 : index
    %29 = vector.load %arg9[%c0_10, %c0_11] : memref<8x128xf32, #tpu.memory_space<vmem>>, vector<8x128xf32>
    %30 = arith.mulf %20, %29 : vector<8x128xf32>
    %31 = arith.mulf %14, %22 : vector<8x128xf32>
    %32 = arith.addf %30, %31 : vector<8x128xf32>
    %33 = math.tanh %32 : vector<8x128xf32>
    %34 = arith.mulf %28, %33 : vector<8x128xf32>
    %c0_12 = arith.constant 0 : index
    %c0_13 = arith.constant 0 : index
    %35 = vector.load %arg8[%c0_12, %c0_13] : memref<8x128xf32, #tpu.memory_space<vmem>>, vector<8x128xf32>
    tpu.vector_store %arg8[%c0_12, %c0_13], %34 {strides = array<i32>} : memref<8x128xf32, #tpu.memory_space<vmem>>, vector<8x128xf32>,
    %c0_14 = arith.constant 0 : index
    %c0_15 = arith.constant 0 : index
    %36 = vector.load %arg9[%c0_14, %c0_15] : memref<8x128xf32, #tpu.memory_space<vmem>>, vector<8x128xf32>
    tpu.vector_store %arg9[%c0_14, %c0_15], %32 {strides = array<i32>} : memref<8x128xf32, #tpu.memory_space<vmem>>, vector<8x128xf32>,
    %c0_16 = arith.constant 0 : index
    %c0_17 = arith.constant 0 : index
    %c0_18 = arith.constant 0 : index
    %37 = vector.load %arg5[%c0_16, %c0_17, %c0_18] : memref<1x8x128xf32, #tpu.memory_space<vmem>>, vector<1x8x128xf32>
    %38 = vector.shape_cast %37 : vector<1x8x128xf32> to vector<8x128xf32>
    %39 = vector.shape_cast %34 : vector<8x128xf32> to vector<1x8x128xf32>
    tpu.vector_store %arg5[%c0_16, %c0_17, %c0_18], %39 {strides = array<i32>} : memref<1x8x128xf32, #tpu.memory_space<vmem>>, vector<1x8x128xf32>,
    %c0_19 = arith.constant 0 : index
    %c0_20 = arith.constant 0 : index
    %40 = vector.load %arg6[%c0_19, %c0_20] : memref<8x128xf32, #tpu.memory_space<vmem>>, vector<8x128xf32>
    tpu.vector_store %arg6[%c0_19, %c0_20], %34 {strides = array<i32>} : memref<8x128xf32, #tpu.memory_space<vmem>>, vector<8x128xf32>,
    %c0_21 = arith.constant 0 : index
    %c0_22 = arith.constant 0 : index
    %41 = vector.load %arg7[%c0_21, %c0_22] : memref<8x128xf32, #tpu.memory_space<vmem>>, vector<8x128xf32>
    tpu.vector_store %arg7[%c0_21, %c0_22], %32 {strides = array<i32>} : memref<8x128xf32, #tpu.memory_space<vmem>>, vector<8x128xf32>,
    return
  }
  func.func @transform_0(%arg0: i32) -> (i32, i32, i32) {
    %c0_i32 = arith.constant 0 : i32
    %c0_i32_0 = arith.constant 0 : i32
    %c0_i32_1 = arith.constant 0 : i32
    return %arg0, %c0_i32, %c0_i32_0 : i32, i32, i32
  }
  func.func @transform_1(%arg0: i32) -> (i32, i32) {
    %c0_i32 = arith.constant 0 : i32
    %c0_i32_0 = arith.constant 0 : i32
    %c0_i32_1 = arith.constant 0 : i32
    return %c0_i32, %c0_i32_0 : i32, i32
  }
  func.func @transform_2(%arg0: i32) -> (i32, i32) {
    %c0_i32 = arith.constant 0 : i32
    %c0_i32_0 = arith.constant 0 : i32
    %c0_i32_1 = arith.constant 0 : i32
    return %c0_i32, %c0_i32_0 : i32, i32
  }
  func.func @transform_3(%arg0: i32) -> (i32, i32) {
    %c0_i32 = arith.constant 0 : i32
    %c0_i32_0 = arith.constant 0 : i32
    %c0_i32_1 = arith.constant 0 : i32
    return %c0_i32, %c0_i32_0 : i32, i32
  }
  func.func @transform_4(%arg0: i32) -> (i32, i32, i32) {
    %c0_i32 = arith.constant 0 : i32
    %c0_i32_0 = arith.constant 0 : i32
    %c0_i32_1 = arith.constant 0 : i32
    return %arg0, %c0_i32, %c0_i32_0 : i32, i32, i32
  }
  func.func @transform_5(%arg0: i32) -> (i32, i32) {
    %c0_i32 = arith.constant 0 : i32
    %c0_i32_0 = arith.constant 0 : i32
    %c0_i32_1 = arith.constant 0 : i32
    return %c0_i32, %c0_i32_0 : i32, i32
  }
  func.func @transform_6(%arg0: i32) -> (i32, i32) {
    %c0_i32 = arith.constant 0 : i32
    %c0_i32_0 = arith.constant 0 : i32
    %c0_i32_1 = arith.constant 0 : i32
    return %c0_i32, %c0_i32_0 : i32, i32
  }
}

</mosaic_0001>

<bundles_post_ra>
// kernel: chatbot_forward.8
= control target key start
LH: loop header
LB: loop body
LE: loop exit
PB: predicated region body
PF: predicated region fallthrough
CT: control target
= control target key end

     0   :  { %12 = vsyncpa [#allocation5], 0  ;;  %s994_s0 = inlined_call_operand.vmem [shape: f32[7,8,512], index: 0, kind: input, shape index: {}]   ;;  %s995_s1 = inlined_call_operand.vmem [shape: f32[128,512], index: 1, kind: input, shape index: {}]   ;;  %s996_s2 = inlined_call_operand.vmem [shape: f32[8,128], index: 2, kind: input, shape index: {}]   ;;  %s997_s3 = inlined_call_operand.vmem [shape: f32[8,128], index: 3, kind: input, shape index: {}]   ;;  %s998_s4 = inlined_call_operand.vmem [shape: f32[7,8,128], index: 4, kind: output, shape index: {0}]   ;;  %s999_s5 = inlined_call_operand.hbm [shape: f32[8,128], index: 5, kind: output, shape index: {1}]   ;;  %s1000_s6 = inlined_call_operand.hbm [shape: f32[8,128], index: 6, kind: output, shape index: {2}]  }
   0x1   :  { %13 = vsyncpa [#allocation7], 0  ;;  %s746_s21 = smov 0  }
   0x2 LB: > { %s752_s22 = sadd.s32 4294967295, %s707_s21   ;;  %p584_p0 = scmp.ge.s32.totalorder %s707_s21, 1  ;;  %s707_s21 = sphi %s746_s21, %s19_s21  }
   0x3   : > { %p209_p1 = scmp.lt.s32.totalorder %s707_s21, 8 }
   0x5   : > { %p210_p2 = pnand %p584_p0, %p209_p1 }
   0x6   : > { %p238_p3 = scmp.lt.s32.totalorder (!%p210_p2), %s752_s22, 6  ;;  %p588_p4 = scmp.ne.s32.totalorder (!%p210_p2), %s752_s22, 0 }
   0x7   : > { %213 = sbr.rel (%p210_p2) target bundleno = 231 (0xe7), region = 36 }
   0xc   : > { %s239_s23 = scalar_select %p238_p3, %s752_s22, 6 }
   0xd   : > { %250 = sbr.rel (%p588_p4) target bundleno = 21 (0x15), region = 40 }
   0xe   : > { %s598_s24 = sshll.u32 %s239_s23, 5  ;;  %s587_s25 = sshll.u32 %s239_s23, 3 }
   0xf   : > { %s761_s28 = scalar_lea.vmem %s994_s0, %s598_s24  ;;  %s766_s7 = scalar_lea.vmem %s998_s4, %s587_s25 }
  0x12   : > { %v251_v0 = vld [vmem:[%s996_s2] sm:$0xff] }
  0x13   : > { %v253_v1 = vld [vmem:[%s997_s3] sm:$0xff]  ;;  %252 = vst [vmem:[#allocation2] sm:$0xff] %v251_v0 }
  0x14   : > { %254 = vst [vmem:[#allocation3] sm:$0xff] %v253_v1 }
  0x15 PF: > { %v320_v2 = vld [vmem:[%s995_s1 + $0x1e0] sm:$0xff]  ;;  %v321_v3 = vld [vmem:[%s995_s1 + $0x1e8] sm:$0xff]  ;;  %v323_v4 = vld [vmem:[%s995_s1 + $0x1f8] sm:$0xff]  ;;  %s504_s25 = sshll.u32 %s1000_s6, 4  ;;  %p607_p5 = scmp.eq.s32.totalorder %s752_s22, 6  ;;  %s505_s25 = int_to_ptr.hbm [resolvable:$true] %s504_s25 }
  0x16   : > { %324 = vmatpush.msra.mxu0 %v320_v2  ;;  %344 = vmatpush.msra.mxu1 %v321_v3  ;;  %v316_v5 = vld [vmem:[%s995_s1 + $0x1c0] sm:$0xff]  ;;  %v317_v6 = vld [vmem:[%s995_s1 + $0x1c8] sm:$0xff]  ;;  %v319_v7 = vld [vmem:[%s995_s1 + $0x1d8] sm:$0xff]  ;;  %s710_s26 = smov [#allocation4]   ;;  %s492_s8 = sshll.u32 %s999_s5, 4  ;;  %s493_s8 = int_to_ptr.hbm [resolvable:$true] %s492_s8 }
  0x17   : > { %384 = vmatpush.msra.mxu3 %v323_v4  ;;  %v312_v8 = vld [vmem:[%s995_s1 + $0x1a0] sm:$0xff]  ;;  %v313_v9 = vld [vmem:[%s995_s1 + $0x1a8] sm:$0xff]  ;;  %v315_v10 = vld [vmem:[%s995_s1 + $0x1b8] sm:$0xff]  ;;  %s490_s27 = sshll.u32 %s710_s26, 4  ;;  %s491_s27 = int_to_ptr.vmem [resolvable:$true] %s490_s27 }
  0x18   : > { %325 = vmatpush.msra.mxu0 %v316_v5  ;;  %345 = vmatpush.msra.mxu1 %v317_v6  ;;  %v308_v11 = vld [vmem:[%s995_s1 + $0x180] sm:$0xff]  ;;  %v309_v12 = vld [vmem:[%s995_s1 + $0x188] sm:$0xff]  ;;  %v311_v13 = vld [vmem:[%s995_s1 + $0x198] sm:$0xff] }
  0x19   : > { %385 = vmatpush.msra.mxu3 %v319_v7  ;;  %v304_v14 = vld [vmem:[%s995_s1 + $0x160] sm:$0xff]  ;;  %v305_v15 = vld [vmem:[%s995_s1 + $0x168] sm:$0xff]  ;;  %v307_v16 = vld [vmem:[%s995_s1 + $0x178] sm:$0xff] }
  0x1a   : > { %326 = vmatpush.msra.mxu0 %v312_v8  ;;  %346 = vmatpush.msra.mxu1 %v313_v9  ;;  %v300_v17 = vld [vmem:[%s995_s1 + $0x140] sm:$0xff]  ;;  %v301_v18 = vld [vmem:[%s995_s1 + $0x148] sm:$0xff]  ;;  %v322_v19 = vld [vmem:[%s995_s1 + $0x1f0] sm:$0xff] }
  0x1b   : > { %386 = vmatpush.msra.mxu3 %v315_v10  ;;  %v303_v20 = vld [vmem:[%s995_s1 + $0x158] sm:$0xff]  ;;  %v318_v21 = vld [vmem:[%s995_s1 + $0x1d0] sm:$0xff]  ;;  %v296_v22 = vld [vmem:[%s995_s1 + $0x120] sm:$0xff]  ;;  %364 = vmatpush.msra.mxu2 %v322_v19 }
  0x1c   : > { %327 = vmatpush.msra.mxu0 %v308_v11  ;;  %347 = vmatpush.msra.mxu1 %v309_v12  ;;  %v297_v23 = vld [vmem:[%s995_s1 + $0x128] sm:$0xff]  ;;  %v299_v24 = vld [vmem:[%s995_s1 + $0x138] sm:$0xff]  ;;  %v314_v25 = vld [vmem:[%s995_s1 + $0x1b0] sm:$0xff] }
  0x1d   : > { %387 = vmatpush.msra.mxu3 %v311_v13  ;;  %v292_v26 = vld [vmem:[%s995_s1 + $0x100] sm:$0xff]  ;;  %v293_v27 = vld [vmem:[%s995_s1 + $0x108] sm:$0xff]  ;;  %365 = vmatpush.msra.mxu2 %v318_v21  ;;  %v295_v28 = vld [vmem:[%s995_s1 + $0x118] sm:$0xff] }
  0x1e   : > { %328 = vmatpush.msra.mxu0 %v304_v14  ;;  %348 = vmatpush.msra.mxu1 %v305_v15  ;;  %v310_v29 = vld [vmem:[%s995_s1 + $0x190] sm:$0xff]  ;;  %v288_v30 = vld [vmem:[%s995_s1 + $0xe0] sm:$0xff]  ;;  %v289_v31 = vld [vmem:[%s995_s1 + $0xe8] sm:$0xff] }
  0x1f   : > { %388 = vmatpush.msra.mxu3 %v307_v16  ;;  %366 = vmatpush.msra.mxu2 %v314_v25  ;;  %v291_v32 = vld [vmem:[%s995_s1 + $0xf8] sm:$0xff]  ;;  %v306_v33 = vld [vmem:[%s995_s1 + $0x170] sm:$0xff]  ;;  %v284_v34 = vld [vmem:[%s995_s1 + $0xc0] sm:$0xff] }
  0x20   : > { %329 = vmatpush.msra.mxu0 %v300_v17  ;;  %349 = vmatpush.msra.mxu1 %v301_v18  ;;  %v285_v35 = vld [vmem:[%s995_s1 + $0xc8] sm:$0xff]  ;;  %v287_v36 = vld [vmem:[%s995_s1 + $0xd8] sm:$0xff]  ;;  %v302_v37 = vld [vmem:[%s995_s1 + $0x150] sm:$0xff] }
  0x21   : > { %389 = vmatpush.msra.mxu3 %v303_v20  ;;  %367 = vmatpush.msra.mxu2 %v310_v29  ;;  %v280_v38 = vld [vmem:[%s995_s1 + $0xa0] sm:$0xff]  ;;  %v281_v39 = vld [vmem:[%s995_s1 + $0xa8] sm:$0xff]  ;;  %v283_v40 = vld [vmem:[%s995_s1 + $0xb8] sm:$0xff] }
  0x22   : > { %330 = vmatpush.msra.mxu0 %v296_v22  ;;  %350 = vmatpush.msra.mxu1 %v297_v23  ;;  %v298_v41 = vld [vmem:[%s995_s1 + $0x130] sm:$0xff]  ;;  %v276_v42 = vld [vmem:[%s995_s1 + $0x80] sm:$0xff]  ;;  %v277_v43 = vld [vmem:[%s995_s1 + $0x88] sm:$0xff] }
  0x23   : > { %390 = vmatpush.msra.mxu3 %v299_v24  ;;  %368 = vmatpush.msra.mxu2 %v306_v33  ;;  %v279_v44 = vld [vmem:[%s995_s1 + $0x98] sm:$0xff]  ;;  %v294_v45 = vld [vmem:[%s995_s1 + $0x110] sm:$0xff]  ;;  %v272_v46 = vld [vmem:[%s995_s1 + $0x60] sm:$0xff] }
  0x24   : > { %331 = vmatpush.msra.mxu0 %v292_v26  ;;  %351 = vmatpush.msra.mxu1 %v293_v27  ;;  %v273_v47 = vld [vmem:[%s995_s1 + $0x68] sm:$0xff]  ;;  %v275_v48 = vld [vmem:[%s995_s1 + $0x78] sm:$0xff]  ;;  %v290_v49 = vld [vmem:[%s995_s1 + $0xf0] sm:$0xff] }
  0x25   : > { %391 = vmatpush.msra.mxu3 %v295_v28  ;;  %369 = vmatpush.msra.mxu2 %v302_v37  ;;  %v268_v50 = vld [vmem:[%s995_s1 + $0x40] sm:$0xff]  ;;  %v269_v51 = vld [vmem:[%s995_s1 + $0x48] sm:$0xff]  ;;  %v271_v52 = vld [vmem:[%s995_s1 + $0x58] sm:$0xff] }
  0x26   : > { %332 = vmatpush.msra.mxu0 %v288_v30  ;;  %352 = vmatpush.msra.mxu1 %v289_v31  ;;  %v286_v53 = vld [vmem:[%s995_s1 + $0xd0] sm:$0xff]  ;;  %v264_v54 = vld [vmem:[%s995_s1 + $0x20] sm:$0xff]  ;;  %v265_v55 = vld [vmem:[%s995_s1 + $0x28] sm:$0xff] }
  0x27   : > { %392 = vmatpush.msra.mxu3 %v291_v32  ;;  %370 = vmatpush.msra.mxu2 %v298_v41  ;;  %v267_v56 = vld [vmem:[%s995_s1 + $0x38] sm:$0xff]  ;;  %v282_v57 = vld [vmem:[%s995_s1 + $0xb0] sm:$0xff]  ;;  %v260_v58 = vld [vmem:[%s995_s1] sm:$0xff] }
  0x28   : > { %333 = vmatpush.msra.mxu0 %v284_v34  ;;  %353 = vmatpush.msra.mxu1 %v285_v35  ;;  %v261_v59 = vld [vmem:[%s995_s1 + $0x8] sm:$0xff]  ;;  %v263_v60 = vld [vmem:[%s995_s1 + $0x18] sm:$0xff]  ;;  %v259_v61 = vld [vmem:[#allocation2] sm:$0xff] }
  0x29   : > { %393 = vmatpush.msra.mxu3 %v287_v36  ;;  %371 = vmatpush.msra.mxu2 %v294_v45  ;;  %v278_v62 = vld [vmem:[%s995_s1 + $0x90] sm:$0xff]  ;;  %v255_v3 = vld [vmem:[%s761_s28] sm:$0xff]  ;;  %v256_v4 = vld [vmem:[%s761_s28 + $0x8] sm:$0xff] }
  0x2a   : > { %334 = vmatpush.msra.mxu0 %v280_v38  ;;  %354 = vmatpush.msra.mxu1 %v281_v39  ;;  %v274_v63 = vld [vmem:[%s995_s1 + $0x70] sm:$0xff]  ;;  %v258_v11 = vld [vmem:[%s761_s28 + $0x18] sm:$0xff] }
  0x2b   : > { %394 = vmatpush.msra.mxu3 %v283_v40  ;;  %372 = vmatpush.msra.mxu2 %v290_v49  ;;  %v270_v0 = vld [vmem:[%s995_s1 + $0x50] sm:$0xff] }
  0x2c   : > { %335 = vmatpush.msra.mxu0 %v276_v42  ;;  %355 = vmatpush.msra.mxu1 %v277_v43  ;;  %v266_v1 = vld [vmem:[%s995_s1 + $0x30] sm:$0xff] }
  0x2d   : > { %395 = vmatpush.msra.mxu3 %v279_v44  ;;  %373 = vmatpush.msra.mxu2 %v286_v53  ;;  %v262_v2 = vld [vmem:[%s995_s1 + $0x10] sm:$0xff]  ;;  %v466_v44 = vld [vmem:[#allocation3] sm:$0xff] }
  0x2e   : > { %336 = vmatpush.msra.mxu0 %v272_v46  ;;  %356 = vmatpush.msra.mxu1 %v273_v47  ;;  %v257_v19 = vld [vmem:[%s761_s28 + $0x10] sm:$0xff]  ;;  %s709_s28 = smov [#allocation6]  }
  0x2f   : > { %396 = vmatpush.msra.mxu3 %v275_v48  ;;  %374 = vmatpush.msra.mxu2 %v282_v57  ;;  %s502_s20 = sshll.u32 %s709_s28, 4  ;;  %s503_s20 = int_to_ptr.vmem [resolvable:$true] %s502_s20 }
  0x30   : > { %337 = vmatpush.msra.mxu0 %v268_v50  ;;  %357 = vmatpush.msra.mxu1 %v269_v51 }
  0x31   : > { %397 = vmatpush.msra.mxu3 %v271_v52  ;;  %375 = vmatpush.msra.mxu2 %v278_v62 }
  0x32   : > { %338 = vmatpush.msra.mxu0 %v264_v54  ;;  %358 = vmatpush.msra.mxu1 %v265_v55 }
  0x33   : > { %398 = vmatpush.msra.mxu3 %v267_v56  ;;  %376 = vmatpush.msra.mxu2 %v274_v63 }
  0x34   : > { %339 = vmatpush.msra.mxu0 %v260_v58  ;;  %359 = vmatpush.msra.mxu1 %v261_v59 }
  0x35   : > { %399 = vmatpush.msra.mxu3 %v263_v60  ;;  %340 = vmatmul.f32.vlgmr.msra.gmra.mxu0 %v259_v61 }
  0x36   : > { %360 = vmatmul.f32.vlgmr.msra.gmra.mxu1 %v259_v61  ;;  %400 = vmatmul.f32.vlgmr.msra.gmra.mxu3 %v259_v61 }
  0x37   : > { %377 = vmatpush.msra.mxu2 %v270_v0 }
  0x39   : > { %378 = vmatpush.msra.mxu2 %v266_v1 }
  0x3b   : > { %379 = vmatpush.msra.mxu2 %v262_v2 }
  0x3c   : > { %380 = vmatmul.f32.vlgmr.msra.gmra.mxu2 %v259_v61 }
  0xb2   : > { %v341_v5 = vpop.f32.mrf.mxu0 }
  0xb3   : > { %v404_v6 = vadd.f32 %v341_v5, %v255_v3  ;;  %v361_v7 = vpop.f32.mrf.mxu1 }
  0xb4   : > { %v405_v8 = vadd.f32 %v361_v7, %v256_v4 }
  0xb5   : > { %v589_v9 = vmul.f32 -1.442695, %v404_v6 }
  0xb6   : > { %v590_v10 = vmul.f32 -1.442695, %v405_v8 }
  0xb7   : > { %621 = vpow2.f32 %v589_v9 }
  0xb8   : > { %623 = vpow2.f32 %v590_v10 }
  0xb9   : > { %v401_v12 = vpop.f32.mrf.mxu3 }
  0xba   : > { %v407_v13 = vadd.f32 %v401_v12, %v258_v11 }
  0xbc   : > { %v591_v14 = vmul.f32 -1.442695, %v407_v13 }
  0xbd   : > { %v622_v15 = vpop.eup %621 }
  0xbe   : > { %v624_v16 = vpop.eup %623  ;;  %v411_v17 = vadd.f32 1.0, %v622_v15  ;;  %625 = vpow2.f32 %v591_v14 }
  0xbf   : > { %v430_v18 = vadd.f32 1.0, %v624_v16  ;;  %v381_v20 = vpop.f32.mrf.mxu2 }
  0xc0   : > { %627 = vrcp.f32 %v411_v17  ;;  %v406_v22 = vadd.f32 %v381_v20, %v257_v19  ;;  %v423_v30 = vand.u32 2147483648, %v411_v17  ;;  %v421_v33 = vand.u32 2147483647, %v411_v17 }
  0xc1   : > { %629 = vrcp.f32 %v430_v18  ;;  %v442_v31 = vand.u32 2147483648, %v430_v18  ;;  %v440_v35 = vand.u32 2147483647, %v430_v18  ;;  %vm417_vm2 = vweird.f32 %v411_v17 }
  0xc2   : > { %vm436_vm3 = vweird.f32 %v430_v18  ;;  %v424_v40 = vor.u32 1.1754944e-38, %v423_v30  ;;  %vm422_vm6 = vcmp.eq.f32.partialorder %v421_v33, 8.507059e+37 }
  0xc3   : > { %v443_v42 = vor.u32 1.1754944e-38, %v442_v31  ;;  %vm441_vm7 = vcmp.eq.f32.partialorder %v440_v35, 8.507059e+37 }
  0xc4   : > { %v626_v21 = vpop.eup %625 }
  0xc5   : > { %v450_v23 = vadd.f32 1.0, %v626_v21 }
  0xc6   : > { %v628_v24 = vpop.eup %627 }
  0xc7   : > { %v630_v25 = vpop.eup %629  ;;  %v413_v26 = vmul.f32 %v628_v24, %v411_v17  ;;  %631 = vrcp.f32 %v450_v23  ;;  %vm418_vm0 = vweird.f32 %v628_v24  ;;  %v462_v54 = vand.u32 2147483648, %v450_v23 }
  0xc8   : > { %v432_v27 = vmul.f32 %v630_v25, %v430_v18  ;;  %633 = vtanh.f32 %v406_v22  ;;  %vm437_vm1 = vweird.f32 %v630_v25  ;;  %vm419_vm4 = vmor %vm417_vm2, %vm418_vm0  ;;  %vm456_vm9 = vweird.f32 %v450_v23 }
  0xc9   : > { %v414_v28 = vsub.f32 1.0, %v413_v26  ;;  %vm438_vm5 = vmor %vm436_vm3, %vm437_vm1  ;;  %v460_v55 = vand.u32 2147483647, %v450_v23  ;;  %v463_v57 = vor.u32 1.1754944e-38, %v462_v54 }
  0xca   : > { %v433_v29 = vsub.f32 1.0, %v432_v27 }
  0xcb   : > { %v415_v32 = vmul.f32 %v628_v24, %v414_v28  ;;  %vm461_vm11 = vcmp.eq.f32.partialorder %v460_v55, 8.507059e+37 }
  0xcc   : > { %v434_v34 = vmul.f32 %v630_v25, %v433_v29 }
  0xcd   : > { %v632_v36 = vpop.eup %631  ;;  %v416_v37 = vadd.f32 %v628_v24, %v415_v32 }
  0xce   : > { %v634_v38 = vpop.eup %633  ;;  %v452_v39 = vmul.f32 %v632_v36, %v450_v23  ;;  %v435_v41 = vadd.f32 %v630_v25, %v434_v34  ;;  %vm457_vm8 = vweird.f32 %v632_v36 }
  0xcf   : > { %v420_v43 = vsel %vm419_vm4, %v628_v24, %v416_v37  ;;  %vm458_vm10 = vmor %vm456_vm9, %vm457_vm8 }
  0xd0   : > { %v453_v45 = vsub.f32 1.0, %v452_v39  ;;  %v425_v46 = vsel %vm422_vm6, %v424_v40, %v420_v43  ;;  %v439_v47 = vsel %vm438_vm5, %v630_v25, %v435_v41 }
  0xd1   : > { %v444_v48 = vsel %vm441_vm7, %v443_v42, %v439_v47  ;;  %v468_v49 = vmul.f32 %v634_v38, %v425_v46 }
  0xd2   : > { %v467_v50 = vmul.f32 %v466_v44, %v444_v48  ;;  %v454_v51 = vmul.f32 %v632_v36, %v453_v45 }
  0xd4   : > { %v469_v52 = vadd.f32 %v468_v49, %v467_v50  ;;  %v455_v53 = vadd.f32 %v632_v36, %v454_v51 }
  0xd6   : > { %635 = vtanh.f32 %v469_v52  ;;  %473 = vst [vmem:[#allocation3] sm:$0xff] %v469_v52  ;;  %v459_v56 = vsel %vm458_vm10, %v632_v36, %v455_v53 }
  0xd7   : > { %476 = vst [vmem:[#allocation6] sm:$0xff] %v469_v52  ;;  %v464_v59 = vsel %vm461_vm11, %v463_v57, %v459_v56 }
  0xd8   : > { %602 = dma.vmem_to_hbm [thread:$0]  (%p607_p5), %s503_s20, 128, %s505_s25, [#allocation7]  }
  0xdc   : > { %v636_v58 = vpop.eup %635 }
  0xdd   : > { %v471_v60 = vmul.f32 %v636_v58, %v464_v59 }
  0xdf   : > { %472 = vst [vmem:[#allocation2] sm:$0xff] %v471_v60 }
  0xe0   : > { %474 = vst [vmem:[%s766_s7] sm:$0xff] %v471_v60 }
  0xe1   : > { %475 = vst [vmem:[#allocation4] sm:$0xff] %v471_v60 }
  0xe2   : > { %600 = dma.vmem_to_hbm [thread:$0]  (%p607_p5), %s491_s27, 128, %s493_s8, [#allocation5]  }
  0xe3   : > { %698 = dma.done.wait (%p607_p5), [#allocation5], 128  }
  0xe4   : > { %700 = vsyncadd (%p607_p5), [#allocation5], 4294967168 }
  0xe5   : > { %702 = dma.done.wait (%p607_p5), [#allocation7], 128  }
  0xe6   : > { %704 = vsyncadd (%p607_p5), [#allocation7], 4294967168 }
  0xe7 PF: > { %s19_s21 = sadd.s32 1, %s707_s21  }
  0xe8   : > { %p16_p6 = scmp.ge.s32.totalorder %s19_s21, 9  }
  0xea   :  { %18 = sbr.rel (!%p16_p6) target bundleno = 2 (0x2), region = 87 }
  0xef   :  { %530 = vsyncpa [#allocation5], 1 }
  0xf0   :  { %532 = vsyncpa [#allocation5 + $0x1], 1 }
  0xf1   :  { %533 = vsyncpa [#allocation7], 1 }

// kernel: chatbot_forward.7
= control target key start
LH: loop header
LB: loop body
LE: loop exit
PB: predicated region body
PF: predicated region fallthrough
CT: control target
= control target key end

     0   :  { %s1088_s12 = smov 0   ;;  %s1090_s13 = smov 0   ;;  %s1454_s0 = inlined_call_operand.vmem [shape: f32[128,128], index: 0, kind: input, shape index: {}]   ;;  %s1455_s1 = inlined_call_operand.vmem [shape: f32[128,512], index: 1, kind: input, shape index: {}]   ;;  %s1456_s2 = inlined_call_operand.vmem [shape: f32[1,512], index: 2, kind: input, shape index: {}]   ;;  %s1457_s3 = inlined_call_operand.vmem [shape: f32[128,512], index: 3, kind: output, shape index: {}]  }
   0x1   :  { %s1092_s14 = smov 0   ;;  %s1094_s15 = smov 0  }
   0x2   :  { %s1096_s16 = smov 0  }
   0x3 LB: > { %s28_s17 = sadd.s32 1, %s1062_s15  ;;  %s937_s18 = sadd.s32 4294967295, %s1066_s16   ;;  %s1066_s16 = sphi %s1096_s16, %s13_s16   ;;  %s1062_s15 = sphi %s1094_s15, %s1462_s15   ;;  %s1058_s14 = sphi %s1092_s14, %s1461_s14   ;;  %s1054_s13 = sphi %s1090_s13, %s1460_s13   ;;  %s1050_s12 = sphi %s1088_s12, %s1459_s12  }
   0x4   : > { %p30_p0 = scmp.ge.s32.totalorder %s28_s17, 2  ;;  %p76_p1 = scmp.ne.s32.totalorder %s1054_s13, %s1050_s12 }
   0x5   : > { %p77_p2 = scmp.eq.s32.totalorder %s1066_s16, 0  ;;  %p134_p4 = scmp.eq.s32.totalorder %s937_s18, 1 }
   0x6   : > { %s1464_s17 = smov (%p30_p0, %s28_s17), 0  ;;  %s69_s20 = sadd.s32 1, %s1054_s13 }
   0x7   : > { %p78_p3 = por %p77_p2, %p76_p1  ;;  %s65_s19 = ssub.s32 %s1062_s15, %s1464_s17 }
   0x8   : > { %p67_p5 = scmp.eq.s32.totalorder %s65_s19, 0  ;;  %p1123_p6 = por %p134_p4, %p76_p1 }
   0x9   : > { %p941_p7 = scmp.ge.s32.totalorder %s1066_s16, 2 }
   0xa   : > { %s1128_s22 = scalar_select %p67_p5, %s1054_s13, %s69_s20  }
   0xb   : > { %168 = sbr.rel (%p941_p7) target bundleno = 52 (0x34), region = 20 }
  0x10   : > { %171 = sbr.rel (!%p78_p3) target bundleno = 52 (0x34), region = 24  ;;  %s173_s23 = sand.u32 (%p78_p3), 1, %s1054_s13  }
  0x11   : > { %s954_s24 = sshll.u32 (%p78_p3), %s1062_s15, 4  ;;  %s942_s25 = sshll.u32 (%p78_p3), %s173_s23, 8 }
  0x12   : > { %s1136_s28 = scalar_lea.vmem (%p78_p3), %s1455_s1, %s954_s24  ;;  %s1141_s29 = scalar_lea.vmem (%p78_p3), [#allocation3], %s942_s25 }
  0x13   : > { %v194_v0 = vld [vmem:[%s1136_s28] sm:$0xff] (%p78_p3)  ;;  %v196_v1 = vld [vmem:[%s1136_s28 + $0x8] sm:$0xff] (%p78_p3) }
  0x14   : > { %v198_v2 = vld [vmem:[%s1136_s28 + $0x20] sm:$0xff] (%p78_p3)  ;;  %195 = vst [vmem:[%s1141_s29] sm:$0xff] (%p78_p3), %v194_v0  ;;  %v200_v3 = vld [vmem:[%s1136_s28 + $0x28] sm:$0xff] (%p78_p3) }
  0x15   : > { %197 = vst [vmem:[%s1141_s29 + $0x8] sm:$0xff] %v196_v1  ;;  %v202_v4 = vld [vmem:[%s1136_s28 + $0x40] sm:$0xff]  ;;  %v204_v5 = vld [vmem:[%s1136_s28 + $0x48] sm:$0xff] }
  0x16   : > { %199 = vst [vmem:[%s1141_s29 + $0x10] sm:$0xff] %v198_v2  ;;  %v206_v6 = vld [vmem:[%s1136_s28 + $0x60] sm:$0xff]  ;;  %v208_v7 = vld [vmem:[%s1136_s28 + $0x68] sm:$0xff] }
  0x17   : > { %201 = vst [vmem:[%s1141_s29 + $0x18] sm:$0xff] %v200_v3  ;;  %v210_v8 = vld [vmem:[%s1136_s28 + $0x80] sm:$0xff]  ;;  %v212_v9 = vld [vmem:[%s1136_s28 + $0x88] sm:$0xff] }
  0x18   : > { %203 = vst [vmem:[%s1141_s29 + $0x20] sm:$0xff] %v202_v4  ;;  %v214_v10 = vld [vmem:[%s1136_s28 + $0xa0] sm:$0xff]  ;;  %v216_v11 = vld [vmem:[%s1136_s28 + $0xa8] sm:$0xff] }
  0x19   : > { %205 = vst [vmem:[%s1141_s29 + $0x28] sm:$0xff] %v204_v5  ;;  %v218_v12 = vld [vmem:[%s1136_s28 + $0xc0] sm:$0xff]  ;;  %v220_v13 = vld [vmem:[%s1136_s28 + $0xc8] sm:$0xff] }
  0x1a   : > { %207 = vst [vmem:[%s1141_s29 + $0x30] sm:$0xff] %v206_v6  ;;  %v222_v14 = vld [vmem:[%s1136_s28 + $0xe0] sm:$0xff]  ;;  %v224_v15 = vld [vmem:[%s1136_s28 + $0xe8] sm:$0xff] }
  0x1b   : > { %209 = vst [vmem:[%s1141_s29 + $0x38] sm:$0xff] %v208_v7  ;;  %v226_v16 = vld [vmem:[%s1136_s28 + $0x100] sm:$0xff]  ;;  %v228_v17 = vld [vmem:[%s1136_s28 + $0x108] sm:$0xff] }
  0x1c   : > { %211 = vst [vmem:[%s1141_s29 + $0x40] sm:$0xff] %v210_v8  ;;  %v230_v18 = vld [vmem:[%s1136_s28 + $0x120] sm:$0xff]  ;;  %v232_v19 = vld [vmem:[%s1136_s28 + $0x128] sm:$0xff] }
  0x1d   : > { %213 = vst [vmem:[%s1141_s29 + $0x48] sm:$0xff] %v212_v9  ;;  %v234_v20 = vld [vmem:[%s1136_s28 + $0x140] sm:$0xff]  ;;  %v236_v21 = vld [vmem:[%s1136_s28 + $0x148] sm:$0xff] }
  0x1e   : > { %215 = vst [vmem:[%s1141_s29 + $0x50] sm:$0xff] %v214_v10  ;;  %v238_v22 = vld [vmem:[%s1136_s28 + $0x160] sm:$0xff]  ;;  %v240_v23 = vld [vmem:[%s1136_s28 + $0x168] sm:$0xff] }
  0x1f   : > { %217 = vst [vmem:[%s1141_s29 + $0x58] sm:$0xff] %v216_v11  ;;  %v242_v24 = vld [vmem:[%s1136_s28 + $0x180] sm:$0xff]  ;;  %v244_v25 = vld [vmem:[%s1136_s28 + $0x188] sm:$0xff] }
  0x20   : > { %219 = vst [vmem:[%s1141_s29 + $0x60] sm:$0xff] %v218_v12  ;;  %v246_v26 = vld [vmem:[%s1136_s28 + $0x1a0] sm:$0xff]  ;;  %v248_v27 = vld [vmem:[%s1136_s28 + $0x1a8] sm:$0xff] }
  0x21   : > { %221 = vst [vmem:[%s1141_s29 + $0x68] sm:$0xff] %v220_v13  ;;  %v250_v28 = vld [vmem:[%s1136_s28 + $0x1c0] sm:$0xff]  ;;  %v252_v29 = vld [vmem:[%s1136_s28 + $0x1c8] sm:$0xff] }
  0x22   : > { %223 = vst [vmem:[%s1141_s29 + $0x70] sm:$0xff] %v222_v14  ;;  %v254_v30 = vld [vmem:[%s1136_s28 + $0x1e0] sm:$0xff]  ;;  %v256_v31 = vld [vmem:[%s1136_s28 + $0x1e8] sm:$0xff] }
  0x23   : > { %225 = vst [vmem:[%s1141_s29 + $0x78] sm:$0xff] %v224_v15 }
  0x24   : > { %227 = vst [vmem:[%s1141_s29 + $0x80] sm:$0xff] %v226_v16 }
  0x25   : > { %229 = vst [vmem:[%s1141_s29 + $0x88] sm:$0xff] %v228_v17 }
  0x26   : > { %231 = vst [vmem:[%s1141_s29 + $0x90] sm:$0xff] %v230_v18 }
  0x27   : > { %233 = vst [vmem:[%s1141_s29 + $0x98] sm:$0xff] %v232_v19 }
  0x28   : > { %235 = vst [vmem:[%s1141_s29 + $0xa0] sm:$0xff] %v234_v20 }
  0x29   : > { %237 = vst [vmem:[%s1141_s29 + $0xa8] sm:$0xff] %v236_v21 }
  0x2a   : > { %239 = vst [vmem:[%s1141_s29 + $0xb0] sm:$0xff] %v238_v22 }
  0x2b   : > { %241 = vst [vmem:[%s1141_s29 + $0xb8] sm:$0xff] %v240_v23 }
  0x2c   : > { %243 = vst [vmem:[%s1141_s29 + $0xc0] sm:$0xff] %v242_v24 }
  0x2d   : > { %245 = vst [vmem:[%s1141_s29 + $0xc8] sm:$0xff] %v244_v25 }
  0x2e   : > { %247 = vst [vmem:[%s1141_s29 + $0xd0] sm:$0xff] %v246_v26 }
  0x2f   : > { %249 = vst [vmem:[%s1141_s29 + $0xd8] sm:$0xff] %v248_v27 }
  0x30   : > { %251 = vst [vmem:[%s1141_s29 + $0xe0] sm:$0xff] %v250_v28 }
  0x31   : > { %253 = vst [vmem:[%s1141_s29 + $0xe8] sm:$0xff] %v252_v29 }
  0x32   : > { %255 = vst [vmem:[%s1141_s29 + $0xf0] sm:$0xff] %v254_v30 }
  0x33   : > { %257 = vst [vmem:[%s1141_s29 + $0xf8] sm:$0xff] %v256_v31 }
  0x34 PF: > { %p945_p8 = scmp.ge.s32.totalorder %s1066_s16, 1  ;;  %p270_p9 = scmp.lt.s32.totalorder %s1066_s16, 3 }
  0x36   : > { %p271_p10 = pnand %p945_p8, %p270_p9 }
  0x37   : > { %s277_s30 = sand.u32 (!%p271_p10), 1, %s1050_s12   ;;  %s948_s26 = sshll.u32 (!%p271_p10), %s1058_s14, 1 }
  0x38   : > { %274 = sbr.rel (%p271_p10) target bundleno = 293 (0x125), region = 51  ;;  %s1207_s4 = sshll.u32 (!%p271_p10), %s277_s30, 8 }
  0x39   : > { %s1210_s5 = scalar_lea.vmem (!%p271_p10), [#allocation3], %s1207_s4  ;;  %p323_p11 = scmp.lt.s32.totalorder (!%p271_p10), %s948_s26, 3 }
  0x3a   : > { %s1303_s30 = scalar_lea.vmem (!%p271_p10), [#allocation4], %s1207_s4 }
  0x3d   : > { %v443_v32 = vld [vmem:[%s1210_s5 + $0xf0] sm:$0xff]  ;;  %v444_v33 = vld [vmem:[%s1210_s5 + $0xf8] sm:$0xff]  ;;  %v441_v34 = vld [vmem:[%s1210_s5 + $0xe0] sm:$0xff]  ;;  %s1466_s26 = smov (!%p323_p11, %s948_s26), 3  ;;  %s955_s4 = sshll.u32 (%p1123_p6), %s1058_s14, 4 }
  0x3e   : > { %956 = vmatpush.msra.mxu2 %v443_v32  ;;  %972 = vmatpush.msra.mxu3 %v444_v33  ;;  %v442_v35 = vld [vmem:[%s1210_s5 + $0xe8] sm:$0xff]  ;;  %v439_v36 = vld [vmem:[%s1210_s5 + $0xd0] sm:$0xff]  ;;  %v440_v37 = vld [vmem:[%s1210_s5 + $0xd8] sm:$0xff]  ;;  %s325_s29 = scalar_lea.vmem %s1456_s2, %s1466_s26  ;;  %s1375_s7 = scalar_lea.vmem (%p1123_p6), %s1457_s3, %s955_s4 }
  0x3f   : > { %445 = vmatpush.msra.mxu0 %v443_v32  ;;  %510 = vmatpush.msra.mxu1 %v444_v33  ;;  %v437_v38 = vld [vmem:[%s1210_s5 + $0xc0] sm:$0xff]  ;;  %v438_v39 = vld [vmem:[%s1210_s5 + $0xc8] sm:$0xff]  ;;  %v435_v40 = vld [vmem:[%s1210_s5 + $0xb0] sm:$0xff] }
  0x40   : > { %957 = vmatpush.msra.mxu2 %v441_v34  ;;  %973 = vmatpush.msra.mxu3 %v442_v35  ;;  %v436_v41 = vld [vmem:[%s1210_s5 + $0xb8] sm:$0xff]  ;;  %v433_v42 = vld [vmem:[%s1210_s5 + $0xa0] sm:$0xff]  ;;  %v434_v43 = vld [vmem:[%s1210_s5 + $0xa8] sm:$0xff] }
  0x41   : > { %446 = vmatpush.msra.mxu0 %v441_v34  ;;  %511 = vmatpush.msra.mxu1 %v442_v35  ;;  %v431_v44 = vld [vmem:[%s1210_s5 + $0x90] sm:$0xff]  ;;  %v432_v45 = vld [vmem:[%s1210_s5 + $0x98] sm:$0xff]  ;;  %v429_v46 = vld [vmem:[%s1210_s5 + $0x80] sm:$0xff] }
  0x42   : > { %958 = vmatpush.msra.mxu2 %v439_v36  ;;  %974 = vmatpush.msra.mxu3 %v440_v37  ;;  %v430_v47 = vld [vmem:[%s1210_s5 + $0x88] sm:$0xff]  ;;  %v427_v48 = vld [vmem:[%s1210_s5 + $0x70] sm:$0xff]  ;;  %v428_v49 = vld [vmem:[%s1210_s5 + $0x78] sm:$0xff] }
  0x43   : > { %447 = vmatpush.msra.mxu0 %v439_v36  ;;  %512 = vmatpush.msra.mxu1 %v440_v37  ;;  %v425_v50 = vld [vmem:[%s1210_s5 + $0x60] sm:$0xff]  ;;  %v426_v51 = vld [vmem:[%s1210_s5 + $0x68] sm:$0xff]  ;;  %v423_v52 = vld [vmem:[%s1210_s5 + $0x50] sm:$0xff] }
  0x44   : > { %959 = vmatpush.msra.mxu2 %v437_v38  ;;  %975 = vmatpush.msra.mxu3 %v438_v39  ;;  %v424_v53 = vld [vmem:[%s1210_s5 + $0x58] sm:$0xff]  ;;  %v421_v54 = vld [vmem:[%s1210_s5 + $0x40] sm:$0xff]  ;;  %v422_v55 = vld [vmem:[%s1210_s5 + $0x48] sm:$0xff] }
  0x45   : > { %448 = vmatpush.msra.mxu0 %v437_v38  ;;  %513 = vmatpush.msra.mxu1 %v438_v39  ;;  %v419_v56 = vld [vmem:[%s1210_s5 + $0x30] sm:$0xff]  ;;  %v420_v57 = vld [vmem:[%s1210_s5 + $0x38] sm:$0xff]  ;;  %v417_v58 = vld [vmem:[%s1210_s5 + $0x20] sm:$0xff] }
  0x46   : > { %960 = vmatpush.msra.mxu2 %v435_v40  ;;  %976 = vmatpush.msra.mxu3 %v436_v41  ;;  %v418_v59 = vld [vmem:[%s1210_s5 + $0x28] sm:$0xff]  ;;  %v415_v60 = vld [vmem:[%s1210_s5 + $0x10] sm:$0xff]  ;;  %v416_v61 = vld [vmem:[%s1210_s5 + $0x18] sm:$0xff] }
  0x47   : > { %449 = vmatpush.msra.mxu0 %v435_v40  ;;  %514 = vmatpush.msra.mxu1 %v436_v41  ;;  %v413_v62 = vld [vmem:[%s1210_s5] sm:$0xff]  ;;  %v414_v63 = vld [vmem:[%s1210_s5 + $0x8] sm:$0xff]  ;;  %v407_v4 = vld [vmem:[%s1454_s0 + $0x50] sm:$0xff] }
  0x48   : > { %961 = vmatpush.msra.mxu2 %v433_v42  ;;  %977 = vmatpush.msra.mxu3 %v434_v43  ;;  %v405_v0 = vld [vmem:[%s1454_s0 + $0x40] sm:$0xff]  ;;  %v406_v2 = vld [vmem:[%s1454_s0 + $0x48] sm:$0xff]  ;;  %v399_v5 = vld [vmem:[%s1454_s0 + $0x10] sm:$0xff] }
  0x49   : > { %450 = vmatpush.msra.mxu0 %v433_v42  ;;  %515 = vmatpush.msra.mxu1 %v434_v43  ;;  %v397_v1 = vld [vmem:[%s1454_s0] sm:$0xff]  ;;  %v398_v3 = vld [vmem:[%s1454_s0 + $0x8] sm:$0xff]  ;;  %v408_v6 = vld [vmem:[%s1454_s0 + $0x58] sm:$0xff] }
  0x4a   : > { %962 = vmatpush.msra.mxu2 %v431_v44  ;;  %978 = vmatpush.msra.mxu3 %v432_v45  ;;  %v400_v7 = vld [vmem:[%s1454_s0 + $0x18] sm:$0xff]  ;;  %v409_v8 = vld [vmem:[%s1454_s0 + $0x60] sm:$0xff]  ;;  %v410_v10 = vld [vmem:[%s1454_s0 + $0x68] sm:$0xff] }
  0x4b   : > { %451 = vmatpush.msra.mxu0 %v431_v44  ;;  %516 = vmatpush.msra.mxu1 %v432_v45  ;;  %v401_v9 = vld [vmem:[%s1454_s0 + $0x20] sm:$0xff]  ;;  %v402_v11 = vld [vmem:[%s1454_s0 + $0x28] sm:$0xff]  ;;  %v411_v12 = vld [vmem:[%s1454_s0 + $0x70] sm:$0xff] }
  0x4c   : > { %963 = vmatpush.msra.mxu2 %v429_v46  ;;  %979 = vmatpush.msra.mxu3 %v430_v47  ;;  %v403_v13 = vld [vmem:[%s1454_s0 + $0x30] sm:$0xff]  ;;  %v412_v14 = vld [vmem:[%s1454_s0 + $0x78] sm:$0xff]  ;;  %v674_v16 = vld [vmem:[%s325_s29] sm:$0x3] }
  0x4d   : > { %452 = vmatpush.msra.mxu0 %v429_v46  ;;  %517 = vmatpush.msra.mxu1 %v430_v47  ;;  %v404_v15 = vld [vmem:[%s1454_s0 + $0x38] sm:$0xff]  ;;  %v1296_v17 = vperm.slane %v674_v16, 0  ;;  %v1298_v18 = vperm.slane %v674_v16, 1 }
  0x4e   : > { %964 = vmatpush.msra.mxu2 %v427_v48  ;;  %980 = vmatpush.msra.mxu3 %v428_v49 }
  0x4f   : > { %453 = vmatpush.msra.mxu0 %v427_v48  ;;  %518 = vmatpush.msra.mxu1 %v428_v49 }
  0x50   : > { %965 = vmatpush.msra.mxu2 %v425_v50  ;;  %981 = vmatpush.msra.mxu3 %v426_v51 }
  0x51   : > { %454 = vmatpush.msra.mxu0 %v425_v50  ;;  %519 = vmatpush.msra.mxu1 %v426_v51 }
  0x52   : > { %966 = vmatpush.msra.mxu2 %v423_v52  ;;  %982 = vmatpush.msra.mxu3 %v424_v53 }
  0x53   : > { %455 = vmatpush.msra.mxu0 %v423_v52  ;;  %520 = vmatpush.msra.mxu1 %v424_v53 }
  0x54   : > { %967 = vmatpush.msra.mxu2 %v421_v54  ;;  %983 = vmatpush.msra.mxu3 %v422_v55 }
  0x55   : > { %456 = vmatpush.msra.mxu0 %v421_v54  ;;  %521 = vmatpush.msra.mxu1 %v422_v55 }
  0x56   : > { %968 = vmatpush.msra.mxu2 %v419_v56  ;;  %984 = vmatpush.msra.mxu3 %v420_v57 }
  0x57   : > { %457 = vmatpush.msra.mxu0 %v419_v56  ;;  %522 = vmatpush.msra.mxu1 %v420_v57 }
  0x58   : > { %969 = vmatpush.msra.mxu2 %v417_v58  ;;  %985 = vmatpush.msra.mxu3 %v418_v59 }
  0x59   : > { %458 = vmatpush.msra.mxu0 %v417_v58  ;;  %523 = vmatpush.msra.mxu1 %v418_v59 }
  0x5a   : > { %970 = vmatpush.msra.mxu2 %v415_v60  ;;  %986 = vmatpush.msra.mxu3 %v416_v61 }
  0x5b   : > { %459 = vmatpush.msra.mxu0 %v415_v60  ;;  %524 = vmatpush.msra.mxu1 %v416_v61 }
  0x5c   : > { %971 = vmatpush.msra.mxu2 %v413_v62  ;;  %987 = vmatpush.msra.mxu3 %v414_v63 }
  0x5d   : > { %485 = vmatmul.f32.vlgmr.msra.gmra.mxu2 %v405_v0  ;;  %550 = vmatmul.f32.vlgmr.msra.gmra.mxu3 %v405_v0 }
  0x5e   : > { %460 = vmatpush.msra.mxu0 %v413_v62  ;;  %525 = vmatpush.msra.mxu1 %v414_v63 }
  0x5f   : > { %461 = vmatmul.f32.vlgmr.msra.gmra.mxu0 %v397_v1  ;;  %526 = vmatmul.f32.vlgmr.msra.gmra.mxu1 %v397_v1 }
  0x65   : > { %488 = vmatmul.f32.gmra.mxu2 %v406_v2  ;;  %553 = vmatmul.f32.gmra.mxu3 %v406_v2 }
  0x67   : > { %464 = vmatmul.f32.gmra.mxu0 %v398_v3  ;;  %529 = vmatmul.f32.gmra.mxu1 %v398_v3 }
  0x6d   : > { %491 = vmatmul.f32.gmra.mxu2 %v407_v4  ;;  %556 = vmatmul.f32.gmra.mxu3 %v407_v4 }
  0x6f   : > { %467 = vmatmul.f32.gmra.mxu0 %v399_v5  ;;  %532 = vmatmul.f32.gmra.mxu1 %v399_v5 }
  0x75   : > { %494 = vmatmul.f32.gmra.mxu2 %v408_v6  ;;  %559 = vmatmul.f32.gmra.mxu3 %v408_v6 }
  0x77   : > { %470 = vmatmul.f32.gmra.mxu0 %v400_v7  ;;  %535 = vmatmul.f32.gmra.mxu1 %v400_v7 }
  0x7d   : > { %497 = vmatmul.f32.gmra.mxu2 %v409_v8  ;;  %562 = vmatmul.f32.gmra.mxu3 %v409_v8 }
  0x7f   : > { %473 = vmatmul.f32.gmra.mxu0 %v401_v9  ;;  %538 = vmatmul.f32.gmra.mxu1 %v401_v9 }
  0x85   : > { %500 = vmatmul.f32.gmra.mxu2 %v410_v10  ;;  %565 = vmatmul.f32.gmra.mxu3 %v410_v10 }
  0x87   : > { %476 = vmatmul.f32.gmra.mxu0 %v402_v11  ;;  %541 = vmatmul.f32.gmra.mxu1 %v402_v11 }
  0x8d   : > { %503 = vmatmul.f32.gmra.mxu2 %v411_v12  ;;  %568 = vmatmul.f32.gmra.mxu3 %v411_v12 }
  0x8f   : > { %479 = vmatmul.f32.gmra.mxu0 %v403_v13  ;;  %544 = vmatmul.f32.gmra.mxu1 %v403_v13 }
  0x95   : > { %506 = vmatmul.f32.gmra.mxu2 %v412_v14  ;;  %571 = vmatmul.f32.gmra.mxu3 %v412_v14 }
  0x97   : > { %482 = vmatmul.f32.gmra.mxu0 %v404_v15  ;;  %547 = vmatmul.f32.gmra.mxu1 %v404_v15 }
  0xdc   : > { %v462_v19 = vpop.f32.mrf.mxu0  ;;  %v527_v20 = vpop.f32.mrf.mxu1 }
  0xdd   : > { %v680_v21 = vadd.f32 %v1296_v17, %v462_v19  ;;  %v681_v22 = vadd.f32 %v1298_v18, %v527_v20 }
  0xdf   : > { %712 = vst [vmem:[%s1303_s30] sm:$0xff] %v680_v21 }
  0xe0   : > { %v486_v23 = vpop.f32.mrf.mxu2  ;;  %713 = vst [vmem:[%s1303_s30 + $0x8] sm:$0xff] %v681_v22  ;;  %v551_v24 = vpop.f32.mrf.mxu3 }
  0xe1   : > { %v696_v25 = vadd.f32 %v1296_v17, %v486_v23  ;;  %v697_v26 = vadd.f32 %v1298_v18, %v551_v24 }
  0xe3   : > { %728 = vst [vmem:[%s1303_s30 + $0x80] sm:$0xff] %v696_v25 }
  0xe4   : > { %729 = vst [vmem:[%s1303_s30 + $0x88] sm:$0xff] %v697_v26  ;;  %v465_v27 = vpop.f32.mrf.mxu0  ;;  %v530_v28 = vpop.f32.mrf.mxu1 }
  0xe5   : > { %v682_v29 = vadd.f32 %v1296_v17, %v465_v27  ;;  %v683_v30 = vadd.f32 %v1298_v18, %v530_v28 }
  0xe6   : > { %v769_v21 = vld [vmem:[%s1303_s30] sm:$0xff] (%p1123_p6) }
  0xe7   : > { %714 = vst [vmem:[%s1303_s30 + $0x10] sm:$0xff] %v682_v29 }
  0xe8   : > { %v489_v31 = vpop.f32.mrf.mxu2  ;;  %715 = vst [vmem:[%s1303_s30 + $0x18] sm:$0xff] %v683_v30  ;;  %v554_v32 = vpop.f32.mrf.mxu3 }
  0xe9   : > { %v698_v33 = vadd.f32 %v1296_v17, %v489_v31  ;;  %v699_v34 = vadd.f32 %v1298_v18, %v554_v32  ;;  %770 = vst [vmem:[%s1375_s7] sm:$0xff] (%p1123_p6), %v769_v21 }
  0xeb   : > { %730 = vst [vmem:[%s1303_s30 + $0x90] sm:$0xff] %v698_v33 }
  0xec   : > { %731 = vst [vmem:[%s1303_s30 + $0x98] sm:$0xff] %v699_v34  ;;  %v468_v35 = vpop.f32.mrf.mxu0  ;;  %v533_v36 = vpop.f32.mrf.mxu1 }
  0xed   : > { %v684_v37 = vadd.f32 %v1296_v17, %v468_v35  ;;  %v685_v38 = vadd.f32 %v1298_v18, %v533_v36  ;;  %v801_v35 = vld [vmem:[%s1303_s30 + $0x80] sm:$0xff] (%p1123_p6)  ;;  %v803_v36 = vld [vmem:[%s1303_s30 + $0x88] sm:$0xff] (%p1123_p6) }
  0xee   : > { %802 = vst [vmem:[%s1375_s7 + $0x100] sm:$0xff] (%p1123_p6), %v801_v35 }
  0xef   : > { %716 = vst [vmem:[%s1303_s30 + $0x20] sm:$0xff] %v684_v37  ;;  %v775_v22 = vld [vmem:[%s1303_s30 + $0x18] sm:$0xff] (%p1123_p6) }
  0xf0   : > { %v492_v39 = vpop.f32.mrf.mxu2  ;;  %717 = vst [vmem:[%s1303_s30 + $0x28] sm:$0xff] %v685_v38  ;;  %v557_v40 = vpop.f32.mrf.mxu3 }
  0xf1   : > { %v700_v41 = vadd.f32 %v1296_v17, %v492_v39  ;;  %v701_v42 = vadd.f32 %v1298_v18, %v557_v40  ;;  %776 = vst [vmem:[%s1375_s7 + $0x28] sm:$0xff] (%p1123_p6), %v775_v22 }
  0xf2   : > { %v805_v37 = vld [vmem:[%s1303_s30 + $0x90] sm:$0xff] (%p1123_p6)  ;;  %804 = vst [vmem:[%s1375_s7 + $0x108] sm:$0xff] (%p1123_p6), %v803_v36 }
  0xf3   : > { %732 = vst [vmem:[%s1303_s30 + $0xa0] sm:$0xff] %v700_v41  ;;  %v807_v38 = vld [vmem:[%s1303_s30 + $0x98] sm:$0xff] (%p1123_p6) }
  0xf4   : > { %733 = vst [vmem:[%s1303_s30 + $0xa8] sm:$0xff] %v701_v42  ;;  %v471_v43 = vpop.f32.mrf.mxu0  ;;  %v536_v44 = vpop.f32.mrf.mxu1 }
  0xf5   : > { %v686_v45 = vadd.f32 %v1296_v17, %v471_v43  ;;  %v687_v46 = vadd.f32 %v1298_v18, %v536_v44  ;;  %806 = vst [vmem:[%s1375_s7 + $0x120] sm:$0xff] (%p1123_p6), %v805_v37 }
  0xf6   : > { %v777_v23 = vld [vmem:[%s1303_s30 + $0x20] sm:$0xff] (%p1123_p6)  ;;  %808 = vst [vmem:[%s1375_s7 + $0x128] sm:$0xff] (%p1123_p6), %v807_v38 }
  0xf7   : > { %718 = vst [vmem:[%s1303_s30 + $0x30] sm:$0xff] %v686_v45  ;;  %v779_v24 = vld [vmem:[%s1303_s30 + $0x28] sm:$0xff] (%p1123_p6) }
  0xf8   : > { %v495_v47 = vpop.f32.mrf.mxu2  ;;  %719 = vst [vmem:[%s1303_s30 + $0x38] sm:$0xff] %v687_v46  ;;  %v560_v48 = vpop.f32.mrf.mxu3 }
  0xf9   : > { %v702_v49 = vadd.f32 %v1296_v17, %v495_v47  ;;  %v703_v50 = vadd.f32 %v1298_v18, %v560_v48  ;;  %778 = vst [vmem:[%s1375_s7 + $0x40] sm:$0xff] (%p1123_p6), %v777_v23 }
  0xfa   : > { %780 = vst [vmem:[%s1375_s7 + $0x48] sm:$0xff] (%p1123_p6), %v779_v24  ;;  %v809_v39 = vld [vmem:[%s1303_s30 + $0xa0] sm:$0xff] (%p1123_p6) }
  0xfb   : > { %734 = vst [vmem:[%s1303_s30 + $0xb0] sm:$0xff] %v702_v49  ;;  %v811_v40 = vld [vmem:[%s1303_s30 + $0xa8] sm:$0xff] (%p1123_p6) }
  0xfc   : > { %735 = vst [vmem:[%s1303_s30 + $0xb8] sm:$0xff] %v703_v50  ;;  %v474_v51 = vpop.f32.mrf.mxu0  ;;  %v539_v52 = vpop.f32.mrf.mxu1 }
  0xfd   : > { %v688_v53 = vadd.f32 %v1296_v17, %v474_v51  ;;  %v689_v54 = vadd.f32 %v1298_v18, %v539_v52  ;;  %810 = vst [vmem:[%s1375_s7 + $0x140] sm:$0xff] (%p1123_p6), %v809_v39 }
  0xfe   : > { %v781_v25 = vld [vmem:[%s1303_s30 + $0x30] sm:$0xff] (%p1123_p6)  ;;  %812 = vst [vmem:[%s1375_s7 + $0x148] sm:$0xff] (%p1123_p6), %v811_v40 }
  0xff   : > { %720 = vst [vmem:[%s1303_s30 + $0x40] sm:$0xff] %v688_v53  ;;  %v783_v26 = vld [vmem:[%s1303_s30 + $0x38] sm:$0xff] (%p1123_p6) }
 0x100   : > { %v498_v55 = vpop.f32.mrf.mxu2  ;;  %721 = vst [vmem:[%s1303_s30 + $0x48] sm:$0xff] %v689_v54  ;;  %v563_v56 = vpop.f32.mrf.mxu3 }
 0x101   : > { %v704_v57 = vadd.f32 %v1296_v17, %v498_v55  ;;  %v705_v58 = vadd.f32 %v1298_v18, %v563_v56  ;;  %782 = vst [vmem:[%s1375_s7 + $0x60] sm:$0xff] (%p1123_p6), %v781_v25 }
 0x102   : > { %784 = vst [vmem:[%s1375_s7 + $0x68] sm:$0xff] (%p1123_p6), %v783_v26  ;;  %v813_v41 = vld [vmem:[%s1303_s30 + $0xb0] sm:$0xff] (%p1123_p6) }
 0x103   : > { %736 = vst [vmem:[%s1303_s30 + $0xc0] sm:$0xff] %v704_v57  ;;  %v815_v42 = vld [vmem:[%s1303_s30 + $0xb8] sm:$0xff] (%p1123_p6) }
 0x104   : > { %737 = vst [vmem:[%s1303_s30 + $0xc8] sm:$0xff] %v705_v58  ;;  %v477_v59 = vpop.f32.mrf.mxu0  ;;  %v542_v60 = vpop.f32.mrf.mxu1 }
 0x105   : > { %v690_v61 = vadd.f32 %v1296_v17, %v477_v59  ;;  %v691_v62 = vadd.f32 %v1298_v18, %v542_v60  ;;  %814 = vst [vmem:[%s1375_s7 + $0x160] sm:$0xff] (%p1123_p6), %v813_v41 }
 0x106   : > { %v785_v27 = vld [vmem:[%s1303_s30 + $0x40] sm:$0xff] (%p1123_p6)  ;;  %816 = vst [vmem:[%s1375_s7 + $0x168] sm:$0xff] (%p1123_p6), %v815_v42 }
 0x107   : > { %722 = vst [vmem:[%s1303_s30 + $0x50] sm:$0xff] %v690_v61  ;;  %v787_v28 = vld [vmem:[%s1303_s30 + $0x48] sm:$0xff] (%p1123_p6) }
 0x108   : > { %v501_v63 = vpop.f32.mrf.mxu2  ;;  %723 = vst [vmem:[%s1303_s30 + $0x58] sm:$0xff] %v691_v62  ;;  %v566_v0 = vpop.f32.mrf.mxu3 }
 0x109   : > { %v706_v1 = vadd.f32 %v1296_v17, %v501_v63  ;;  %v707_v2 = vadd.f32 %v1298_v18, %v566_v0  ;;  %786 = vst [vmem:[%s1375_s7 + $0x80] sm:$0xff] (%p1123_p6), %v785_v27 }
 0x10a   : > { %788 = vst [vmem:[%s1375_s7 + $0x88] sm:$0xff] (%p1123_p6), %v787_v28  ;;  %v817_v43 = vld [vmem:[%s1303_s30 + $0xc0] sm:$0xff] (%p1123_p6) }
 0x10b   : > { %738 = vst [vmem:[%s1303_s30 + $0xd0] sm:$0xff] %v706_v1  ;;  %v819_v44 = vld [vmem:[%s1303_s30 + $0xc8] sm:$0xff] (%p1123_p6) }
 0x10c   : > { %739 = vst [vmem:[%s1303_s30 + $0xd8] sm:$0xff] %v707_v2  ;;  %v480_v3 = vpop.f32.mrf.mxu0  ;;  %v545_v4 = vpop.f32.mrf.mxu1 }
 0x10d   : > { %v692_v5 = vadd.f32 %v1296_v17, %v480_v3  ;;  %v693_v6 = vadd.f32 %v1298_v18, %v545_v4  ;;  %818 = vst [vmem:[%s1375_s7 + $0x180] sm:$0xff] (%p1123_p6), %v817_v43 }
 0x10e   : > { %v789_v29 = vld [vmem:[%s1303_s30 + $0x50] sm:$0xff] (%p1123_p6)  ;;  %820 = vst [vmem:[%s1375_s7 + $0x188] sm:$0xff] (%p1123_p6), %v819_v44 }
 0x10f   : > { %724 = vst [vmem:[%s1303_s30 + $0x60] sm:$0xff] %v692_v5  ;;  %v791_v30 = vld [vmem:[%s1303_s30 + $0x58] sm:$0xff] (%p1123_p6) }
 0x110   : > { %v504_v7 = vpop.f32.mrf.mxu2  ;;  %725 = vst [vmem:[%s1303_s30 + $0x68] sm:$0xff] %v693_v6  ;;  %v569_v8 = vpop.f32.mrf.mxu3 }
 0x111   : > { %v708_v9 = vadd.f32 %v1296_v17, %v504_v7  ;;  %v709_v10 = vadd.f32 %v1298_v18, %v569_v8  ;;  %790 = vst [vmem:[%s1375_s7 + $0xa0] sm:$0xff] (%p1123_p6), %v789_v29 }
 0x112   : > { %792 = vst [vmem:[%s1375_s7 + $0xa8] sm:$0xff] (%p1123_p6), %v791_v30  ;;  %v821_v45 = vld [vmem:[%s1303_s30 + $0xd0] sm:$0xff] (%p1123_p6) }
 0x113   : > { %740 = vst [vmem:[%s1303_s30 + $0xe0] sm:$0xff] %v708_v9  ;;  %v823_v46 = vld [vmem:[%s1303_s30 + $0xd8] sm:$0xff] (%p1123_p6) }
 0x114   : > { %741 = vst [vmem:[%s1303_s30 + $0xe8] sm:$0xff] %v709_v10  ;;  %v483_v11 = vpop.f32.mrf.mxu0  ;;  %v548_v12 = vpop.f32.mrf.mxu1 }
 0x115   : > { %v694_v13 = vadd.f32 %v1296_v17, %v483_v11  ;;  %v695_v14 = vadd.f32 %v1298_v18, %v548_v12  ;;  %822 = vst [vmem:[%s1375_s7 + $0x1a0] sm:$0xff] (%p1123_p6), %v821_v45 }
 0x116   : > { %v793_v31 = vld [vmem:[%s1303_s30 + $0x60] sm:$0xff] (%p1123_p6)  ;;  %824 = vst [vmem:[%s1375_s7 + $0x1a8] sm:$0xff] (%p1123_p6), %v823_v46 }
 0x117   : > { %726 = vst [vmem:[%s1303_s30 + $0x70] sm:$0xff] %v694_v13  ;;  %v795_v32 = vld [vmem:[%s1303_s30 + $0x68] sm:$0xff] (%p1123_p6) }
 0x118   : > { %v507_v15 = vpop.f32.mrf.mxu2  ;;  %727 = vst [vmem:[%s1303_s30 + $0x78] sm:$0xff] %v695_v14  ;;  %v572_v16 = vpop.f32.mrf.mxu3  ;;  %750 = sbr.rel (!%p1123_p6) target bundleno = 293 (0x125), region = 67 }
 0x119   : > { %v710_v19 = vadd.f32 %v1296_v17, %v507_v15  ;;  %v711_v20 = vadd.f32 %v1298_v18, %v572_v16  ;;  %v771_v17 = vld [vmem:[%s1303_s30 + $0x8] sm:$0xff] (%p1123_p6)  ;;  %v773_v18 = vld [vmem:[%s1303_s30 + $0x10] sm:$0xff] (%p1123_p6)  ;;  %794 = vst [vmem:[%s1375_s7 + $0xc0] sm:$0xff] (%p1123_p6), %v793_v31 }
 0x11a   : > { %772 = vst [vmem:[%s1375_s7 + $0x8] sm:$0xff] (%p1123_p6), %v771_v17  ;;  %v825_v47 = vld [vmem:[%s1303_s30 + $0xe0] sm:$0xff] (%p1123_p6) }
 0x11b   : > { %742 = vst [vmem:[%s1303_s30 + $0xf0] sm:$0xff] %v710_v19  ;;  %v827_v48 = vld [vmem:[%s1303_s30 + $0xe8] sm:$0xff] (%p1123_p6) }
 0x11c   : > { %743 = vst [vmem:[%s1303_s30 + $0xf8] sm:$0xff] %v711_v20 }
 0x11d   : > { %774 = vst [vmem:[%s1375_s7 + $0x20] sm:$0xff] %v773_v18 }
 0x11e   : > { %v797_v33 = vld [vmem:[%s1303_s30 + $0x70] sm:$0xff]  ;;  %796 = vst [vmem:[%s1375_s7 + $0xc8] sm:$0xff] %v795_v32 }
 0x11f   : > { %v799_v34 = vld [vmem:[%s1303_s30 + $0x78] sm:$0xff]  ;;  %798 = vst [vmem:[%s1375_s7 + $0xe0] sm:$0xff] %v797_v33 }
 0x120   : > { %800 = vst [vmem:[%s1375_s7 + $0xe8] sm:$0xff] %v799_v34 }
 0x121   : > { %826 = vst [vmem:[%s1375_s7 + $0x1c0] sm:$0xff] %v825_v47 }
 0x122   : > { %v829_v49 = vld [vmem:[%s1303_s30 + $0xf0] sm:$0xff]  ;;  %828 = vst [vmem:[%s1375_s7 + $0x1c8] sm:$0xff] %v827_v48 }
 0x123   : > { %v831_v50 = vld [vmem:[%s1303_s30 + $0xf8] sm:$0xff]  ;;  %830 = vst [vmem:[%s1375_s7 + $0x1e0] sm:$0xff] %v829_v49 }
 0x124   : > { %832 = vst [vmem:[%s1375_s7 + $0x1e8] sm:$0xff] %v831_v50 }
 0x125 PF: > { %s13_s16 = sadd.s32 1, %s1066_s16   ;;  %s1459_s12 = smov %s1054_s13 }
 0x126   : > { %p10_p12 = scmp.ge.s32.totalorder %s13_s16, 4   ;;  %s1460_s13 = smov %s1128_s22 }
 0x127   : > { %s1461_s14 = smov %s1062_s15  ;;  %s1462_s15 = smov %s1464_s17 }
 0x128   :  { %12 = sbr.rel (!%p10_p12) target bundleno = 3 (0x3), region = 127 }

// kernel: chatbot_forward.9
= control target key start
LH: loop header
LB: loop body
LE: loop exit
PB: predicated region body
PF: predicated region fallthrough
CT: control target
= control target key end

     0   :  { %s764_s1 = inlined_call_operand.vmem [shape: f32[128,256], index: 1, kind: input, shape index: {}]   ;;  %s765_s0 = inlined_call_operand.vmem [shape: f32[128,128], index: 0, kind: input, shape index: {}]   ;;  %s766_s2 = inlined_call_operand.vmem [shape: f32[1,256], index: 2, kind: input, shape index: {}]   ;;  %s767_s3 = inlined_call_operand.vmem [shape: f32[128,256], index: 3, kind: output, shape index: {}]  }
   0x1   :  { %v128_v0 = vld [vmem:[%s764_s1 + $0xf0] sm:$0xff]  ;;  %v129_v1 = vld [vmem:[%s764_s1 + $0xf8] sm:$0xff]  ;;  %v126_v2 = vld [vmem:[%s764_s1 + $0xe0] sm:$0xff] }
   0x2   :  { %433 = vmatpush.msra.mxu2 %v128_v0  ;;  %449 = vmatpush.msra.mxu3 %v129_v1  ;;  %v127_v3 = vld [vmem:[%s764_s1 + $0xe8] sm:$0xff]  ;;  %v124_v4 = vld [vmem:[%s764_s1 + $0xd0] sm:$0xff]  ;;  %v125_v5 = vld [vmem:[%s764_s1 + $0xd8] sm:$0xff] }
   0x3   :  { %130 = vmatpush.msra.mxu0 %v128_v0  ;;  %195 = vmatpush.msra.mxu1 %v129_v1  ;;  %v122_v6 = vld [vmem:[%s764_s1 + $0xc0] sm:$0xff]  ;;  %v123_v7 = vld [vmem:[%s764_s1 + $0xc8] sm:$0xff]  ;;  %v120_v8 = vld [vmem:[%s764_s1 + $0xb0] sm:$0xff] }
   0x4   :  { %434 = vmatpush.msra.mxu2 %v126_v2  ;;  %450 = vmatpush.msra.mxu3 %v127_v3  ;;  %v121_v9 = vld [vmem:[%s764_s1 + $0xb8] sm:$0xff]  ;;  %v118_v10 = vld [vmem:[%s764_s1 + $0xa0] sm:$0xff]  ;;  %v119_v11 = vld [vmem:[%s764_s1 + $0xa8] sm:$0xff] }
   0x5   :  { %131 = vmatpush.msra.mxu0 %v126_v2  ;;  %196 = vmatpush.msra.mxu1 %v127_v3  ;;  %v116_v12 = vld [vmem:[%s764_s1 + $0x90] sm:$0xff]  ;;  %v117_v13 = vld [vmem:[%s764_s1 + $0x98] sm:$0xff]  ;;  %v114_v14 = vld [vmem:[%s764_s1 + $0x80] sm:$0xff] }
   0x6   :  { %435 = vmatpush.msra.mxu2 %v124_v4  ;;  %451 = vmatpush.msra.mxu3 %v125_v5  ;;  %v115_v15 = vld [vmem:[%s764_s1 + $0x88] sm:$0xff]  ;;  %v112_v16 = vld [vmem:[%s764_s1 + $0x70] sm:$0xff]  ;;  %v113_v17 = vld [vmem:[%s764_s1 + $0x78] sm:$0xff] }
   0x7   :  { %132 = vmatpush.msra.mxu0 %v124_v4  ;;  %197 = vmatpush.msra.mxu1 %v125_v5  ;;  %v110_v18 = vld [vmem:[%s764_s1 + $0x60] sm:$0xff]  ;;  %v111_v19 = vld [vmem:[%s764_s1 + $0x68] sm:$0xff]  ;;  %v108_v20 = vld [vmem:[%s764_s1 + $0x50] sm:$0xff] }
   0x8   :  { %436 = vmatpush.msra.mxu2 %v122_v6  ;;  %452 = vmatpush.msra.mxu3 %v123_v7  ;;  %v109_v21 = vld [vmem:[%s764_s1 + $0x58] sm:$0xff]  ;;  %v106_v22 = vld [vmem:[%s764_s1 + $0x40] sm:$0xff]  ;;  %v107_v23 = vld [vmem:[%s764_s1 + $0x48] sm:$0xff] }
   0x9   :  { %133 = vmatpush.msra.mxu0 %v122_v6  ;;  %198 = vmatpush.msra.mxu1 %v123_v7  ;;  %v104_v24 = vld [vmem:[%s764_s1 + $0x30] sm:$0xff]  ;;  %v105_v25 = vld [vmem:[%s764_s1 + $0x38] sm:$0xff]  ;;  %v102_v26 = vld [vmem:[%s764_s1 + $0x20] sm:$0xff] }
   0xa   :  { %437 = vmatpush.msra.mxu2 %v120_v8  ;;  %453 = vmatpush.msra.mxu3 %v121_v9  ;;  %v103_v27 = vld [vmem:[%s764_s1 + $0x28] sm:$0xff]  ;;  %v100_v28 = vld [vmem:[%s764_s1 + $0x10] sm:$0xff]  ;;  %v101_v29 = vld [vmem:[%s764_s1 + $0x18] sm:$0xff] }
   0xb   :  { %134 = vmatpush.msra.mxu0 %v120_v8  ;;  %199 = vmatpush.msra.mxu1 %v121_v9  ;;  %v98_v30 = vld [vmem:[%s764_s1] sm:$0xff]  ;;  %v99_v31 = vld [vmem:[%s764_s1 + $0x8] sm:$0xff]  ;;  %v92_v36 = vld [vmem:[%s765_s0 + $0x50] sm:$0xff] }
   0xc   :  { %438 = vmatpush.msra.mxu2 %v118_v10  ;;  %454 = vmatpush.msra.mxu3 %v119_v11  ;;  %v90_v32 = vld [vmem:[%s765_s0 + $0x40] sm:$0xff]  ;;  %v91_v34 = vld [vmem:[%s765_s0 + $0x48] sm:$0xff]  ;;  %v84_v37 = vld [vmem:[%s765_s0 + $0x10] sm:$0xff] }
   0xd   :  { %135 = vmatpush.msra.mxu0 %v118_v10  ;;  %200 = vmatpush.msra.mxu1 %v119_v11  ;;  %v82_v33 = vld [vmem:[%s765_s0] sm:$0xff]  ;;  %v83_v35 = vld [vmem:[%s765_s0 + $0x8] sm:$0xff]  ;;  %v93_v38 = vld [vmem:[%s765_s0 + $0x58] sm:$0xff] }
   0xe   :  { %439 = vmatpush.msra.mxu2 %v116_v12  ;;  %455 = vmatpush.msra.mxu3 %v117_v13  ;;  %v85_v39 = vld [vmem:[%s765_s0 + $0x18] sm:$0xff]  ;;  %v94_v40 = vld [vmem:[%s765_s0 + $0x60] sm:$0xff]  ;;  %v95_v42 = vld [vmem:[%s765_s0 + $0x68] sm:$0xff] }
   0xf   :  { %136 = vmatpush.msra.mxu0 %v116_v12  ;;  %201 = vmatpush.msra.mxu1 %v117_v13  ;;  %v86_v41 = vld [vmem:[%s765_s0 + $0x20] sm:$0xff]  ;;  %v87_v43 = vld [vmem:[%s765_s0 + $0x28] sm:$0xff]  ;;  %v96_v44 = vld [vmem:[%s765_s0 + $0x70] sm:$0xff] }
  0x10   :  { %440 = vmatpush.msra.mxu2 %v114_v14  ;;  %456 = vmatpush.msra.mxu3 %v115_v15  ;;  %v88_v45 = vld [vmem:[%s765_s0 + $0x30] sm:$0xff]  ;;  %v97_v46 = vld [vmem:[%s765_s0 + $0x78] sm:$0xff]  ;;  %v359_v48 = vld [vmem:[%s766_s2] sm:$0x3] }
  0x11   :  { %137 = vmatpush.msra.mxu0 %v114_v14  ;;  %202 = vmatpush.msra.mxu1 %v115_v15  ;;  %v89_v47 = vld [vmem:[%s765_s0 + $0x38] sm:$0xff]  ;;  %v632_v49 = vperm.slane %v359_v48, 0  ;;  %v634_v50 = vperm.slane %v359_v48, 1 }
  0x12   :  { %441 = vmatpush.msra.mxu2 %v112_v16  ;;  %457 = vmatpush.msra.mxu3 %v113_v17 }
  0x13   :  { %138 = vmatpush.msra.mxu0 %v112_v16  ;;  %203 = vmatpush.msra.mxu1 %v113_v17 }
  0x14   :  { %442 = vmatpush.msra.mxu2 %v110_v18  ;;  %458 = vmatpush.msra.mxu3 %v111_v19 }
  0x15   :  { %139 = vmatpush.msra.mxu0 %v110_v18  ;;  %204 = vmatpush.msra.mxu1 %v111_v19 }
  0x16   :  { %443 = vmatpush.msra.mxu2 %v108_v20  ;;  %459 = vmatpush.msra.mxu3 %v109_v21 }
  0x17   :  { %140 = vmatpush.msra.mxu0 %v108_v20  ;;  %205 = vmatpush.msra.mxu1 %v109_v21 }
  0x18   :  { %444 = vmatpush.msra.mxu2 %v106_v22  ;;  %460 = vmatpush.msra.mxu3 %v107_v23 }
  0x19   :  { %141 = vmatpush.msra.mxu0 %v106_v22  ;;  %206 = vmatpush.msra.mxu1 %v107_v23 }
  0x1a   :  { %445 = vmatpush.msra.mxu2 %v104_v24  ;;  %461 = vmatpush.msra.mxu3 %v105_v25 }
  0x1b   :  { %142 = vmatpush.msra.mxu0 %v104_v24  ;;  %207 = vmatpush.msra.mxu1 %v105_v25 }
  0x1c   :  { %446 = vmatpush.msra.mxu2 %v102_v26  ;;  %462 = vmatpush.msra.mxu3 %v103_v27 }
  0x1d   :  { %143 = vmatpush.msra.mxu0 %v102_v26  ;;  %208 = vmatpush.msra.mxu1 %v103_v27 }
  0x1e   :  { %447 = vmatpush.msra.mxu2 %v100_v28  ;;  %463 = vmatpush.msra.mxu3 %v101_v29 }
  0x1f   :  { %144 = vmatpush.msra.mxu0 %v100_v28  ;;  %209 = vmatpush.msra.mxu1 %v101_v29 }
  0x20   :  { %448 = vmatpush.msra.mxu2 %v98_v30  ;;  %464 = vmatpush.msra.mxu3 %v99_v31 }
  0x21   :  { %170 = vmatmul.f32.vlgmr.msra.gmra.mxu2 %v90_v32  ;;  %235 = vmatmul.f32.vlgmr.msra.gmra.mxu3 %v90_v32 }
  0x22   :  { %145 = vmatpush.msra.mxu0 %v98_v30  ;;  %210 = vmatpush.msra.mxu1 %v99_v31 }
  0x23   :  { %146 = vmatmul.f32.vlgmr.msra.gmra.mxu0 %v82_v33  ;;  %211 = vmatmul.f32.vlgmr.msra.gmra.mxu1 %v82_v33 }
  0x29   :  { %173 = vmatmul.f32.gmra.mxu2 %v91_v34  ;;  %238 = vmatmul.f32.gmra.mxu3 %v91_v34 }
  0x2b   :  { %149 = vmatmul.f32.gmra.mxu0 %v83_v35  ;;  %214 = vmatmul.f32.gmra.mxu1 %v83_v35 }
  0x31   :  { %176 = vmatmul.f32.gmra.mxu2 %v92_v36  ;;  %241 = vmatmul.f32.gmra.mxu3 %v92_v36 }
  0x33   :  { %152 = vmatmul.f32.gmra.mxu0 %v84_v37  ;;  %217 = vmatmul.f32.gmra.mxu1 %v84_v37 }
  0x39   :  { %179 = vmatmul.f32.gmra.mxu2 %v93_v38  ;;  %244 = vmatmul.f32.gmra.mxu3 %v93_v38 }
  0x3b   :  { %155 = vmatmul.f32.gmra.mxu0 %v85_v39  ;;  %220 = vmatmul.f32.gmra.mxu1 %v85_v39 }
  0x41   :  { %182 = vmatmul.f32.gmra.mxu2 %v94_v40  ;;  %247 = vmatmul.f32.gmra.mxu3 %v94_v40 }
  0x43   :  { %158 = vmatmul.f32.gmra.mxu0 %v86_v41  ;;  %223 = vmatmul.f32.gmra.mxu1 %v86_v41 }
  0x49   :  { %185 = vmatmul.f32.gmra.mxu2 %v95_v42  ;;  %250 = vmatmul.f32.gmra.mxu3 %v95_v42 }
  0x4b   :  { %161 = vmatmul.f32.gmra.mxu0 %v87_v43  ;;  %226 = vmatmul.f32.gmra.mxu1 %v87_v43 }
  0x51   :  { %188 = vmatmul.f32.gmra.mxu2 %v96_v44  ;;  %253 = vmatmul.f32.gmra.mxu3 %v96_v44 }
  0x53   :  { %164 = vmatmul.f32.gmra.mxu0 %v88_v45  ;;  %229 = vmatmul.f32.gmra.mxu1 %v88_v45 }
  0x59   :  { %191 = vmatmul.f32.gmra.mxu2 %v97_v46  ;;  %256 = vmatmul.f32.gmra.mxu3 %v97_v46 }
  0x5b   :  { %167 = vmatmul.f32.gmra.mxu0 %v89_v47  ;;  %232 = vmatmul.f32.gmra.mxu1 %v89_v47 }
  0xa0   :  { %v147_v51 = vpop.f32.mrf.mxu0  ;;  %v212_v52 = vpop.f32.mrf.mxu1 }
  0xa1   :  { %v365_v53 = vadd.f32 %v632_v49, %v147_v51  ;;  %v366_v54 = vadd.f32 %v634_v50, %v212_v52 }
  0xa3   :  { %397 = vst [vmem:[%s767_s3] sm:$0xff] %v365_v53 }
  0xa4   :  { %v171_v55 = vpop.f32.mrf.mxu2  ;;  %398 = vst [vmem:[%s767_s3 + $0x8] sm:$0xff] %v366_v54  ;;  %v236_v56 = vpop.f32.mrf.mxu3 }
  0xa5   :  { %v381_v57 = vadd.f32 %v632_v49, %v171_v55  ;;  %v382_v58 = vadd.f32 %v634_v50, %v236_v56 }
  0xa7   :  { %413 = vst [vmem:[%s767_s3 + $0x80] sm:$0xff] %v381_v57 }
  0xa8   :  { %414 = vst [vmem:[%s767_s3 + $0x88] sm:$0xff] %v382_v58  ;;  %v150_v59 = vpop.f32.mrf.mxu0  ;;  %v215_v60 = vpop.f32.mrf.mxu1 }
  0xa9   :  { %v367_v61 = vadd.f32 %v632_v49, %v150_v59  ;;  %v368_v62 = vadd.f32 %v634_v50, %v215_v60 }
  0xab   :  { %399 = vst [vmem:[%s767_s3 + $0x10] sm:$0xff] %v367_v61 }
  0xac   :  { %v174_v63 = vpop.f32.mrf.mxu2  ;;  %400 = vst [vmem:[%s767_s3 + $0x18] sm:$0xff] %v368_v62  ;;  %v239_v0 = vpop.f32.mrf.mxu3 }
  0xad   :  { %v383_v1 = vadd.f32 %v632_v49, %v174_v63  ;;  %v384_v2 = vadd.f32 %v634_v50, %v239_v0 }
  0xaf   :  { %415 = vst [vmem:[%s767_s3 + $0x90] sm:$0xff] %v383_v1 }
  0xb0   :  { %416 = vst [vmem:[%s767_s3 + $0x98] sm:$0xff] %v384_v2  ;;  %v153_v3 = vpop.f32.mrf.mxu0  ;;  %v218_v4 = vpop.f32.mrf.mxu1 }
  0xb1   :  { %v369_v5 = vadd.f32 %v632_v49, %v153_v3  ;;  %v370_v6 = vadd.f32 %v634_v50, %v218_v4 }
  0xb3   :  { %401 = vst [vmem:[%s767_s3 + $0x20] sm:$0xff] %v369_v5 }
  0xb4   :  { %v177_v7 = vpop.f32.mrf.mxu2  ;;  %402 = vst [vmem:[%s767_s3 + $0x28] sm:$0xff] %v370_v6  ;;  %v242_v8 = vpop.f32.mrf.mxu3 }
  0xb5   :  { %v385_v9 = vadd.f32 %v632_v49, %v177_v7  ;;  %v386_v10 = vadd.f32 %v634_v50, %v242_v8 }
  0xb7   :  { %417 = vst [vmem:[%s767_s3 + $0xa0] sm:$0xff] %v385_v9 }
  0xb8   :  { %418 = vst [vmem:[%s767_s3 + $0xa8] sm:$0xff] %v386_v10  ;;  %v156_v11 = vpop.f32.mrf.mxu0  ;;  %v221_v12 = vpop.f32.mrf.mxu1 }
  0xb9   :  { %v371_v13 = vadd.f32 %v632_v49, %v156_v11  ;;  %v372_v14 = vadd.f32 %v634_v50, %v221_v12 }
  0xbb   :  { %403 = vst [vmem:[%s767_s3 + $0x30] sm:$0xff] %v371_v13 }
  0xbc   :  { %v180_v15 = vpop.f32.mrf.mxu2  ;;  %404 = vst [vmem:[%s767_s3 + $0x38] sm:$0xff] %v372_v14  ;;  %v245_v16 = vpop.f32.mrf.mxu3 }
  0xbd   :  { %v387_v17 = vadd.f32 %v632_v49, %v180_v15  ;;  %v388_v18 = vadd.f32 %v634_v50, %v245_v16 }
  0xbf   :  { %419 = vst [vmem:[%s767_s3 + $0xb0] sm:$0xff] %v387_v17 }
  0xc0   :  { %420 = vst [vmem:[%s767_s3 + $0xb8] sm:$0xff] %v388_v18  ;;  %v159_v19 = vpop.f32.mrf.mxu0  ;;  %v224_v20 = vpop.f32.mrf.mxu1 }
  0xc1   :  { %v373_v21 = vadd.f32 %v632_v49, %v159_v19  ;;  %v374_v22 = vadd.f32 %v634_v50, %v224_v20 }
  0xc3   :  { %405 = vst [vmem:[%s767_s3 + $0x40] sm:$0xff] %v373_v21 }
  0xc4   :  { %v183_v23 = vpop.f32.mrf.mxu2  ;;  %406 = vst [vmem:[%s767_s3 + $0x48] sm:$0xff] %v374_v22  ;;  %v248_v24 = vpop.f32.mrf.mxu3 }
  0xc5   :  { %v389_v25 = vadd.f32 %v632_v49, %v183_v23  ;;  %v390_v26 = vadd.f32 %v634_v50, %v248_v24 }
  0xc7   :  { %421 = vst [vmem:[%s767_s3 + $0xc0] sm:$0xff] %v389_v25 }
  0xc8   :  { %422 = vst [vmem:[%s767_s3 + $0xc8] sm:$0xff] %v390_v26  ;;  %v162_v27 = vpop.f32.mrf.mxu0  ;;  %v227_v28 = vpop.f32.mrf.mxu1 }
  0xc9   :  { %v375_v29 = vadd.f32 %v632_v49, %v162_v27  ;;  %v376_v30 = vadd.f32 %v634_v50, %v227_v28 }
  0xcb   :  { %407 = vst [vmem:[%s767_s3 + $0x50] sm:$0xff] %v375_v29 }
  0xcc   :  { %v186_v31 = vpop.f32.mrf.mxu2  ;;  %408 = vst [vmem:[%s767_s3 + $0x58] sm:$0xff] %v376_v30  ;;  %v251_v32 = vpop.f32.mrf.mxu3 }
  0xcd   :  { %v391_v33 = vadd.f32 %v632_v49, %v186_v31  ;;  %v392_v34 = vadd.f32 %v634_v50, %v251_v32 }
  0xcf   :  { %423 = vst [vmem:[%s767_s3 + $0xd0] sm:$0xff] %v391_v33 }
  0xd0   :  { %424 = vst [vmem:[%s767_s3 + $0xd8] sm:$0xff] %v392_v34  ;;  %v165_v35 = vpop.f32.mrf.mxu0  ;;  %v230_v36 = vpop.f32.mrf.mxu1 }
  0xd1   :  { %v377_v37 = vadd.f32 %v632_v49, %v165_v35  ;;  %v378_v38 = vadd.f32 %v634_v50, %v230_v36 }
  0xd3   :  { %409 = vst [vmem:[%s767_s3 + $0x60] sm:$0xff] %v377_v37 }
  0xd4   :  { %v189_v39 = vpop.f32.mrf.mxu2  ;;  %410 = vst [vmem:[%s767_s3 + $0x68] sm:$0xff] %v378_v38  ;;  %v254_v40 = vpop.f32.mrf.mxu3 }
  0xd5   :  { %v393_v41 = vadd.f32 %v632_v49, %v189_v39  ;;  %v394_v42 = vadd.f32 %v634_v50, %v254_v40 }
  0xd7   :  { %425 = vst [vmem:[%s767_s3 + $0xe0] sm:$0xff] %v393_v41 }
  0xd8   :  { %426 = vst [vmem:[%s767_s3 + $0xe8] sm:$0xff] %v394_v42  ;;  %v168_v43 = vpop.f32.mrf.mxu0  ;;  %v233_v44 = vpop.f32.mrf.mxu1 }
  0xd9   :  { %v379_v45 = vadd.f32 %v632_v49, %v168_v43  ;;  %v380_v46 = vadd.f32 %v634_v50, %v233_v44 }
  0xdb   :  { %411 = vst [vmem:[%s767_s3 + $0x70] sm:$0xff] %v379_v45 }
  0xdc   :  { %v192_v47 = vpop.f32.mrf.mxu2  ;;  %412 = vst [vmem:[%s767_s3 + $0x78] sm:$0xff] %v380_v46  ;;  %v257_v48 = vpop.f32.mrf.mxu3 }
  0xdd   :  { %v395_v51 = vadd.f32 %v632_v49, %v192_v47  ;;  %v396_v52 = vadd.f32 %v634_v50, %v257_v48 }
  0xdf   :  { %427 = vst [vmem:[%s767_s3 + $0xf0] sm:$0xff] %v395_v51 }
  0xe0   :  { %428 = vst [vmem:[%s767_s3 + $0xf8] sm:$0xff] %v396_v52 }

// kernel: chatbot_forward.6
= control target key start
LH: loop header
LB: loop body
LE: loop exit
PB: predicated region body
PF: predicated region fallthrough
CT: control target
= control target key end

     0   :  { %12 = vsyncpa [#allocation5], 0  ;;  %s1039_s0 = inlined_call_operand.vmem [shape: f32[8,8,512], index: 0, kind: input, shape index: {}]   ;;  %s1040_s1 = inlined_call_operand.vmem [shape: f32[128,512], index: 1, kind: input, shape index: {}]   ;;  %s1041_s2 = inlined_call_operand.vmem [shape: f32[8,128], index: 2, kind: input, shape index: {}, may-alias: {2,3}]   ;;  %s1042_s3 = inlined_call_operand.vmem [shape: f32[8,128], index: 3, kind: input, shape index: {}, may-alias: {2,3}]   ;;  %s1043_s4 = inlined_call_operand.hbm [shape: f32[8,8,128], index: 4, kind: output, shape index: {0}]   ;;  %s1044_s5 = inlined_call_operand.vmem [shape: f32[8,128], index: 5, kind: output, shape index: {1}]   ;;  %s1045_s6 = inlined_call_operand.vmem [shape: f32[8,128], index: 6, kind: output, shape index: {2}]  }
   0x1   :  { %14 = vsyncpa [#allocation5 + $0x1], 0  ;;  %s732_s21 = smov 0   ;;  %s734_s22 = smov 0  }
   0x2   :  { %s736_s23 = smov 0   ;;  %s738_s24 = smov 0  }
   0x3 LB: > { %s753_s25 = sadd.s32 4294967295, %s695_s24   ;;  %s562_s26 = sadd.s32 4294967294, %s695_s24   ;;  %s695_s24 = sphi %s738_s24, %s1051_s24   ;;  %s691_s23 = sphi %s736_s23, %s1050_s23   ;;  %s687_s22 = sphi %s734_s22, %s1049_s22   ;;  %s683_s21 = sphi %s732_s21, %s1048_s21  }
   0x4   : > { %s757_s27 = sadd.s32 1, %s695_s24   ;;  %s116_s28 = sadd.s32 1, %s691_s23 }
   0x5   : > { %s113_s29 = ssub.s32 %s695_s24, %s757_s27  ;;  %p126_p0 = scmp.ne.s32.totalorder %s691_s23, %s687_s22 }
   0x6   : > { %p114_p1 = scmp.eq.s32.totalorder %s113_s29, 0  ;;  %p127_p2 = scmp.eq.s32.totalorder %s753_s25, 7 }
   0x7   : > { %p132_p3 = scmp.ne.s32.totalorder %s687_s22, %s683_s21  ;;  %p133_p4 = scmp.eq.s32.totalorder %s562_s26, 7 }
   0x8   : > { %s768_s30 = scalar_select %p114_p1, %s691_s23, %s116_s28  }
   0x9   : > { %p770_p5 = por %p127_p2, %p126_p0  ;;  %p774_p6 = por %p133_p4, %p132_p3 }
   0xa   : > { %p565_p7 = scmp.ge.s32.totalorder %s695_s24, 1  ;;  %p210_p8 = scmp.lt.s32.totalorder %s695_s24, 9 }
   0xc   : > { %p211_p9 = pnand %p565_p7, %p210_p8 }
   0xd   : > { %s233_s9 = sand.u32 (!%p211_p9), 1, %s687_s22   ;;  %p240_p10 = scmp.lt.s32.totalorder (!%p211_p9), %s753_s25, 7 }
   0xe   : > { %214 = sbr.rel (%p211_p9) target bundleno = 235 (0xeb), region = 36  ;;  %s784_s10 = sshll.u32 (!%p211_p9), %s233_s9, 3 }
   0xf   : > { %s235_s16 = scalar_lea.vmem (!%p211_p9), [#allocation4], %s784_s10  ;;  %p569_p11 = scmp.ne.s32.totalorder (!%p211_p9), %s753_s25, 0 }
  0x13   : > { %s241_s11 = scalar_select %p240_p10, %s753_s25, 7 }
  0x14   : > { %248 = sbr.rel (%p569_p11) target bundleno = 28 (0x1c), region = 40 }
  0x15   : > { %s577_s12 = sshll.u32 %s241_s11, 5 }
  0x16   : > { %s790_s15 = scalar_lea.vmem %s1039_s0, %s577_s12 }
  0x19   : > { %v249_v0 = vld [vmem:[%s1041_s2] sm:$0xff] }
  0x1a   : > { %v251_v1 = vld [vmem:[%s1042_s3] sm:$0xff]  ;;  %250 = vst [vmem:[#allocation2] sm:$0xff] %v249_v0 }
  0x1b   : > { %252 = vst [vmem:[#allocation3] sm:$0xff] %v251_v1 }
  0x1c PF: > { %v318_v2 = vld [vmem:[%s1040_s1 + $0x1e0] sm:$0xff]  ;;  %v319_v3 = vld [vmem:[%s1040_s1 + $0x1e8] sm:$0xff]  ;;  %v321_v4 = vld [vmem:[%s1040_s1 + $0x1f8] sm:$0xff]  ;;  %s476_s12 = scalar_lea.sflag [#allocation5], %s233_s9  ;;  %s653_s18 = scalar_lea.hbm %s1043_s4, 64 }
  0x1d   : > { %322 = vmatpush.msra.mxu0 %v318_v2  ;;  %342 = vmatpush.msra.mxu1 %v319_v3  ;;  %v314_v5 = vld [vmem:[%s1040_s1 + $0x1c0] sm:$0xff]  ;;  %v315_v6 = vld [vmem:[%s1040_s1 + $0x1c8] sm:$0xff]  ;;  %v317_v7 = vld [vmem:[%s1040_s1 + $0x1d8] sm:$0xff] }
  0x1e   : > { %382 = vmatpush.msra.mxu3 %v321_v4  ;;  %v310_v8 = vld [vmem:[%s1040_s1 + $0x1a0] sm:$0xff]  ;;  %v311_v9 = vld [vmem:[%s1040_s1 + $0x1a8] sm:$0xff]  ;;  %v313_v10 = vld [vmem:[%s1040_s1 + $0x1b8] sm:$0xff] }
  0x1f   : > { %323 = vmatpush.msra.mxu0 %v314_v5  ;;  %343 = vmatpush.msra.mxu1 %v315_v6  ;;  %v306_v11 = vld [vmem:[%s1040_s1 + $0x180] sm:$0xff]  ;;  %v307_v12 = vld [vmem:[%s1040_s1 + $0x188] sm:$0xff]  ;;  %v309_v13 = vld [vmem:[%s1040_s1 + $0x198] sm:$0xff] }
  0x20   : > { %383 = vmatpush.msra.mxu3 %v317_v7  ;;  %v302_v14 = vld [vmem:[%s1040_s1 + $0x160] sm:$0xff]  ;;  %v303_v15 = vld [vmem:[%s1040_s1 + $0x168] sm:$0xff]  ;;  %v305_v16 = vld [vmem:[%s1040_s1 + $0x178] sm:$0xff] }
  0x21   : > { %324 = vmatpush.msra.mxu0 %v310_v8  ;;  %344 = vmatpush.msra.mxu1 %v311_v9  ;;  %v298_v17 = vld [vmem:[%s1040_s1 + $0x140] sm:$0xff]  ;;  %v299_v18 = vld [vmem:[%s1040_s1 + $0x148] sm:$0xff]  ;;  %v320_v19 = vld [vmem:[%s1040_s1 + $0x1f0] sm:$0xff] }
  0x22   : > { %384 = vmatpush.msra.mxu3 %v313_v10  ;;  %v301_v20 = vld [vmem:[%s1040_s1 + $0x158] sm:$0xff]  ;;  %v316_v21 = vld [vmem:[%s1040_s1 + $0x1d0] sm:$0xff]  ;;  %v294_v22 = vld [vmem:[%s1040_s1 + $0x120] sm:$0xff]  ;;  %362 = vmatpush.msra.mxu2 %v320_v19 }
  0x23   : > { %325 = vmatpush.msra.mxu0 %v306_v11  ;;  %345 = vmatpush.msra.mxu1 %v307_v12  ;;  %v295_v23 = vld [vmem:[%s1040_s1 + $0x128] sm:$0xff]  ;;  %v297_v24 = vld [vmem:[%s1040_s1 + $0x138] sm:$0xff]  ;;  %v312_v25 = vld [vmem:[%s1040_s1 + $0x1b0] sm:$0xff] }
  0x24   : > { %385 = vmatpush.msra.mxu3 %v309_v13  ;;  %v290_v26 = vld [vmem:[%s1040_s1 + $0x100] sm:$0xff]  ;;  %v291_v27 = vld [vmem:[%s1040_s1 + $0x108] sm:$0xff]  ;;  %363 = vmatpush.msra.mxu2 %v316_v21  ;;  %v293_v28 = vld [vmem:[%s1040_s1 + $0x118] sm:$0xff] }
  0x25   : > { %326 = vmatpush.msra.mxu0 %v302_v14  ;;  %346 = vmatpush.msra.mxu1 %v303_v15  ;;  %v308_v29 = vld [vmem:[%s1040_s1 + $0x190] sm:$0xff]  ;;  %v286_v30 = vld [vmem:[%s1040_s1 + $0xe0] sm:$0xff]  ;;  %v287_v31 = vld [vmem:[%s1040_s1 + $0xe8] sm:$0xff] }
  0x26   : > { %386 = vmatpush.msra.mxu3 %v305_v16  ;;  %364 = vmatpush.msra.mxu2 %v312_v25  ;;  %v289_v32 = vld [vmem:[%s1040_s1 + $0xf8] sm:$0xff]  ;;  %v304_v33 = vld [vmem:[%s1040_s1 + $0x170] sm:$0xff]  ;;  %v282_v34 = vld [vmem:[%s1040_s1 + $0xc0] sm:$0xff] }
  0x27   : > { %327 = vmatpush.msra.mxu0 %v298_v17  ;;  %347 = vmatpush.msra.mxu1 %v299_v18  ;;  %v283_v35 = vld [vmem:[%s1040_s1 + $0xc8] sm:$0xff]  ;;  %v285_v36 = vld [vmem:[%s1040_s1 + $0xd8] sm:$0xff]  ;;  %v300_v37 = vld [vmem:[%s1040_s1 + $0x150] sm:$0xff] }
  0x28   : > { %387 = vmatpush.msra.mxu3 %v301_v20  ;;  %365 = vmatpush.msra.mxu2 %v308_v29  ;;  %v278_v38 = vld [vmem:[%s1040_s1 + $0xa0] sm:$0xff]  ;;  %v279_v39 = vld [vmem:[%s1040_s1 + $0xa8] sm:$0xff]  ;;  %v281_v40 = vld [vmem:[%s1040_s1 + $0xb8] sm:$0xff] }
  0x29   : > { %328 = vmatpush.msra.mxu0 %v294_v22  ;;  %348 = vmatpush.msra.mxu1 %v295_v23  ;;  %v296_v41 = vld [vmem:[%s1040_s1 + $0x130] sm:$0xff]  ;;  %v274_v42 = vld [vmem:[%s1040_s1 + $0x80] sm:$0xff]  ;;  %v275_v43 = vld [vmem:[%s1040_s1 + $0x88] sm:$0xff] }
  0x2a   : > { %388 = vmatpush.msra.mxu3 %v297_v24  ;;  %366 = vmatpush.msra.mxu2 %v304_v33  ;;  %v277_v44 = vld [vmem:[%s1040_s1 + $0x98] sm:$0xff]  ;;  %v292_v45 = vld [vmem:[%s1040_s1 + $0x110] sm:$0xff]  ;;  %v270_v46 = vld [vmem:[%s1040_s1 + $0x60] sm:$0xff] }
  0x2b   : > { %329 = vmatpush.msra.mxu0 %v290_v26  ;;  %349 = vmatpush.msra.mxu1 %v291_v27  ;;  %v271_v47 = vld [vmem:[%s1040_s1 + $0x68] sm:$0xff]  ;;  %v273_v48 = vld [vmem:[%s1040_s1 + $0x78] sm:$0xff]  ;;  %v288_v49 = vld [vmem:[%s1040_s1 + $0xf0] sm:$0xff] }
  0x2c   : > { %389 = vmatpush.msra.mxu3 %v293_v28  ;;  %367 = vmatpush.msra.mxu2 %v300_v37  ;;  %v266_v50 = vld [vmem:[%s1040_s1 + $0x40] sm:$0xff]  ;;  %v267_v51 = vld [vmem:[%s1040_s1 + $0x48] sm:$0xff]  ;;  %v269_v52 = vld [vmem:[%s1040_s1 + $0x58] sm:$0xff] }
  0x2d   : > { %330 = vmatpush.msra.mxu0 %v286_v30  ;;  %350 = vmatpush.msra.mxu1 %v287_v31  ;;  %v284_v53 = vld [vmem:[%s1040_s1 + $0xd0] sm:$0xff]  ;;  %v262_v54 = vld [vmem:[%s1040_s1 + $0x20] sm:$0xff]  ;;  %v263_v55 = vld [vmem:[%s1040_s1 + $0x28] sm:$0xff] }
  0x2e   : > { %390 = vmatpush.msra.mxu3 %v289_v32  ;;  %368 = vmatpush.msra.mxu2 %v296_v41  ;;  %v265_v56 = vld [vmem:[%s1040_s1 + $0x38] sm:$0xff]  ;;  %v280_v57 = vld [vmem:[%s1040_s1 + $0xb0] sm:$0xff]  ;;  %v258_v58 = vld [vmem:[%s1040_s1] sm:$0xff] }
  0x2f   : > { %331 = vmatpush.msra.mxu0 %v282_v34  ;;  %351 = vmatpush.msra.mxu1 %v283_v35  ;;  %v259_v59 = vld [vmem:[%s1040_s1 + $0x8] sm:$0xff]  ;;  %v261_v60 = vld [vmem:[%s1040_s1 + $0x18] sm:$0xff]  ;;  %v257_v61 = vld [vmem:[#allocation2] sm:$0xff] }
  0x30   : > { %391 = vmatpush.msra.mxu3 %v285_v36  ;;  %369 = vmatpush.msra.mxu2 %v292_v45  ;;  %v276_v62 = vld [vmem:[%s1040_s1 + $0x90] sm:$0xff]  ;;  %v253_v3 = vld [vmem:[%s790_s15] sm:$0xff]  ;;  %v254_v4 = vld [vmem:[%s790_s15 + $0x8] sm:$0xff] }
  0x31   : > { %332 = vmatpush.msra.mxu0 %v278_v38  ;;  %352 = vmatpush.msra.mxu1 %v279_v39  ;;  %v272_v63 = vld [vmem:[%s1040_s1 + $0x70] sm:$0xff]  ;;  %v256_v11 = vld [vmem:[%s790_s15 + $0x18] sm:$0xff] }
  0x32   : > { %392 = vmatpush.msra.mxu3 %v281_v40  ;;  %370 = vmatpush.msra.mxu2 %v288_v49  ;;  %v268_v0 = vld [vmem:[%s1040_s1 + $0x50] sm:$0xff] }
  0x33   : > { %333 = vmatpush.msra.mxu0 %v274_v42  ;;  %353 = vmatpush.msra.mxu1 %v275_v43  ;;  %v264_v1 = vld [vmem:[%s1040_s1 + $0x30] sm:$0xff] }
  0x34   : > { %393 = vmatpush.msra.mxu3 %v277_v44  ;;  %371 = vmatpush.msra.mxu2 %v284_v53  ;;  %v260_v2 = vld [vmem:[%s1040_s1 + $0x10] sm:$0xff]  ;;  %v464_v44 = vld [vmem:[#allocation3] sm:$0xff] }
  0x35   : > { %334 = vmatpush.msra.mxu0 %v270_v46  ;;  %354 = vmatpush.msra.mxu1 %v271_v47  ;;  %v255_v19 = vld [vmem:[%s790_s15 + $0x10] sm:$0xff]  ;;  %s574_s15 = sshll.u32 %s753_s25, 3  ;;  %s488_s25 = sshll.u32 %s235_s16, 4  ;;  %s489_s25 = int_to_ptr.vmem [resolvable:$true] %s488_s25 }
  0x36   : > { %394 = vmatpush.msra.mxu3 %v273_v48  ;;  %372 = vmatpush.msra.mxu2 %v280_v57  ;;  %s486_s26 = scalar_lea.hbm %s1043_s4, %s574_s15 }
  0x37   : > { %335 = vmatpush.msra.mxu0 %v266_v50  ;;  %355 = vmatpush.msra.mxu1 %v267_v51  ;;  %s490_s28 = sshll.u32 %s486_s26, 4  ;;  %s491_s28 = int_to_ptr.hbm [resolvable:$true] %s490_s28 }
  0x38   : > { %395 = vmatpush.msra.mxu3 %v269_v52  ;;  %373 = vmatpush.msra.mxu2 %v276_v62  ;;  %s647_s13 = sshra.s32 %s491_s28, 4  ;;  %s648_s13 = int_to_ptr.hbm [resolvable:$true] %s647_s13 }
  0x39   : > { %336 = vmatpush.msra.mxu0 %v262_v54  ;;  %356 = vmatpush.msra.mxu1 %v263_v55  ;;  %s649_s14 = scalar_lea.hbm %s648_s13, 8  ;;  %p654_p1 = scmp.lt.s32.totalorder %s648_s13, %s1043_s4 }
  0x3a   : > { %396 = vmatpush.msra.mxu3 %v265_v56  ;;  %374 = vmatpush.msra.mxu2 %v272_v63  ;;  %p650_p12 = scmp.ne.s32.totalorder %s648_s13, %s649_s14  ;;  %p655_p2 = scmp.lt.s32.totalorder %s653_s18, %s649_s14 }
  0x3b   : > { %337 = vmatpush.msra.mxu0 %v258_v58  ;;  %357 = vmatpush.msra.mxu1 %v259_v59 }
  0x3c   : > { %397 = vmatpush.msra.mxu3 %v261_v60  ;;  %338 = vmatmul.f32.vlgmr.msra.gmra.mxu0 %v257_v61  ;;  %p651_p13 = pnand %p650_p12, %p770_p5  ;;  %p656_p3 = por %p655_p2, %p654_p1 }
  0x3d   : > { %358 = vmatmul.f32.vlgmr.msra.gmra.mxu1 %v257_v61  ;;  %398 = vmatmul.f32.vlgmr.msra.gmra.mxu3 %v257_v61 }
  0x3e   : > { %375 = vmatpush.msra.mxu2 %v268_v0  ;;  %p652_p0 = pneg %p651_p13 }
  0x40   : > { %376 = vmatpush.msra.mxu2 %v264_v1  ;;  %p657_p4 = pnand %p656_p3, %p652_p0 }
  0x42   : > { %377 = vmatpush.msra.mxu2 %v260_v2 }
  0x43   : > { %378 = vmatmul.f32.vlgmr.msra.gmra.mxu2 %v257_v61 }
  0xb9   : > { %v339_v5 = vpop.f32.mrf.mxu0 }
  0xba   : > { %v402_v6 = vadd.f32 %v339_v5, %v253_v3  ;;  %v359_v7 = vpop.f32.mrf.mxu1 }
  0xbb   : > { %v403_v8 = vadd.f32 %v359_v7, %v254_v4 }
  0xbc   : > { %v570_v9 = vmul.f32 -1.442695, %v402_v6 }
  0xbd   : > { %v571_v10 = vmul.f32 -1.442695, %v403_v8 }
  0xbe   : > { %617 = vpow2.f32 %v570_v9 }
  0xbf   : > { %619 = vpow2.f32 %v571_v10 }
  0xc0   : > { %v399_v12 = vpop.f32.mrf.mxu3 }
  0xc1   : > { %v405_v13 = vadd.f32 %v399_v12, %v256_v11 }
  0xc3   : > { %v572_v14 = vmul.f32 -1.442695, %v405_v13 }
  0xc4   : > { %v618_v15 = vpop.eup %617 }
  0xc5   : > { %v620_v16 = vpop.eup %619  ;;  %v409_v17 = vadd.f32 1.0, %v618_v15  ;;  %621 = vpow2.f32 %v572_v14 }
  0xc6   : > { %v428_v18 = vadd.f32 1.0, %v620_v16  ;;  %v379_v20 = vpop.f32.mrf.mxu2 }
  0xc7   : > { %623 = vrcp.f32 %v409_v17  ;;  %v404_v22 = vadd.f32 %v379_v20, %v255_v19  ;;  %v421_v30 = vand.u32 2147483648, %v409_v17  ;;  %v419_v33 = vand.u32 2147483647, %v409_v17 }
  0xc8   : > { %625 = vrcp.f32 %v428_v18  ;;  %v440_v31 = vand.u32 2147483648, %v428_v18  ;;  %v438_v35 = vand.u32 2147483647, %v428_v18  ;;  %vm415_vm2 = vweird.f32 %v409_v17 }
  0xc9   : > { %vm434_vm3 = vweird.f32 %v428_v18  ;;  %v422_v40 = vor.u32 1.1754944e-38, %v421_v30  ;;  %vm420_vm6 = vcmp.eq.f32.partialorder %v419_v33, 8.507059e+37 }
  0xca   : > { %v441_v42 = vor.u32 1.1754944e-38, %v440_v31  ;;  %vm439_vm7 = vcmp.eq.f32.partialorder %v438_v35, 8.507059e+37 }
  0xcb   : > { %v622_v21 = vpop.eup %621 }
  0xcc   : > { %v448_v23 = vadd.f32 1.0, %v622_v21 }
  0xcd   : > { %v624_v24 = vpop.eup %623 }
  0xce   : > { %v626_v25 = vpop.eup %625  ;;  %v411_v26 = vmul.f32 %v624_v24, %v409_v17  ;;  %627 = vrcp.f32 %v448_v23  ;;  %vm416_vm0 = vweird.f32 %v624_v24  ;;  %v460_v54 = vand.u32 2147483648, %v448_v23 }
  0xcf   : > { %v430_v27 = vmul.f32 %v626_v25, %v428_v18  ;;  %629 = vtanh.f32 %v404_v22  ;;  %vm435_vm1 = vweird.f32 %v626_v25  ;;  %vm417_vm4 = vmor %vm415_vm2, %vm416_vm0  ;;  %vm454_vm9 = vweird.f32 %v448_v23 }
  0xd0   : > { %v412_v28 = vsub.f32 1.0, %v411_v26  ;;  %vm436_vm5 = vmor %vm434_vm3, %vm435_vm1  ;;  %v458_v55 = vand.u32 2147483647, %v448_v23  ;;  %v461_v57 = vor.u32 1.1754944e-38, %v460_v54 }
  0xd1   : > { %v431_v29 = vsub.f32 1.0, %v430_v27 }
  0xd2   : > { %v413_v32 = vmul.f32 %v624_v24, %v412_v28  ;;  %vm459_vm11 = vcmp.eq.f32.partialorder %v458_v55, 8.507059e+37 }
  0xd3   : > { %v432_v34 = vmul.f32 %v626_v25, %v431_v29 }
  0xd4   : > { %v628_v36 = vpop.eup %627  ;;  %v414_v37 = vadd.f32 %v624_v24, %v413_v32 }
  0xd5   : > { %v630_v38 = vpop.eup %629  ;;  %v450_v39 = vmul.f32 %v628_v36, %v448_v23  ;;  %v433_v41 = vadd.f32 %v626_v25, %v432_v34  ;;  %vm455_vm8 = vweird.f32 %v628_v36 }
  0xd6   : > { %v418_v43 = vsel %vm417_vm4, %v624_v24, %v414_v37  ;;  %vm456_vm10 = vmor %vm454_vm9, %vm455_vm8 }
  0xd7   : > { %v451_v45 = vsub.f32 1.0, %v450_v39  ;;  %v423_v46 = vsel %vm420_vm6, %v422_v40, %v418_v43  ;;  %v437_v47 = vsel %vm436_vm5, %v626_v25, %v433_v41 }
  0xd8   : > { %v442_v48 = vsel %vm439_vm7, %v441_v42, %v437_v47  ;;  %v466_v49 = vmul.f32 %v630_v38, %v423_v46 }
  0xd9   : > { %v465_v50 = vmul.f32 %v464_v44, %v442_v48  ;;  %v452_v51 = vmul.f32 %v628_v36, %v451_v45 }
  0xdb   : > { %v467_v52 = vadd.f32 %v466_v49, %v465_v50  ;;  %v453_v53 = vadd.f32 %v628_v36, %v452_v51 }
  0xdd   : > { %631 = vtanh.f32 %v467_v52  ;;  %471 = vst [vmem:[#allocation3] sm:$0xff] %v467_v52  ;;  %v457_v56 = vsel %vm456_vm10, %v628_v36, %v453_v53 }
  0xde   : > { %474 = vst [vmem:[%s1045_s6] sm:$0xff] %v467_v52  ;;  %v462_v59 = vsel %vm459_vm11, %v461_v57, %v457_v56 }
  0xe3   : > { %v632_v58 = vpop.eup %631 }
  0xe4   : > { %v469_v60 = vmul.f32 %v632_v58, %v462_v59 }
  0xe6   : > { %470 = vst [vmem:[#allocation2] sm:$0xff] %v469_v60 }
  0xe7   : > { %472 = vst [vmem:[%s235_s16] sm:$0xff] %v469_v60 }
  0xe8   : > { %473 = vst [vmem:[%s1044_s5] sm:$0xff] %v469_v60 }
  0xe9   : > { %660 = shalt.err (!%p657_p4)
}
  0xea   : > { %578 = dma.vmem_to_hbm [thread:$0]  (%p770_p5), %s489_s25, 128, %s491_s28, %s476_s12  }
  0xeb PF: > { %p584_p7 = scmp.ge.s32.totalorder %s695_s24, 2  ;;  %s514_s9 = sand.u32 1, %s683_s21  }
  0xec   : > { %s515_s16 = scalar_lea.sflag [#allocation5], %s514_s9 }
  0xed   : > { %p581_p8 = pnand %p584_p7, %p774_p6 }
  0xef   : > { %p582_p9 = pneg %p581_p8 }
  0xf1   : > { %678 = dma.done.wait (%p582_p9), %s515_s16, 128  }
  0xf2   : > { %680 = vsyncadd (%p582_p9), %s515_s16, 4294967168  ;;  %p17_p10 = scmp.ge.s32.totalorder %s757_s27, 10   ;;  %s1048_s21 = smov %s687_s22 }
  0xf3   : > { %s1049_s22 = smov %s691_s23  ;;  %s1050_s23 = smov %s768_s30 }
  0xf4   : > { %s1051_s24 = smov %s757_s27  ;;  %19 = sbr.rel (!%p17_p10) target bundleno = 3 (0x3), region = 91 }
  0xf9   :  { %521 = vsyncpa [#allocation5], 1 }
  0xfa   :  { %523 = vsyncpa [#allocation5 + $0x1], 1 }

</bundles_post_ra>
